<compile_context>
chip_gen: v6e
topology: v6e:2x2x1
jax: 0.10.0
libtpu: 0.0.40
codegen_flags: <defaults>
</compile_context>

<pallas_src>
import numpy as np
import jax
import jax.numpy as jnp
from jax.experimental import pallas as pl
from jax.experimental.pallas import tpu as pltpu

DIMS = [2, 128, 64, 32, 16, 8, 1, 8, 16, 32, 64, 128, 2]
NUM_LAYERS = 12
LANE = 128
SS_LANES = 512                    # packed sign slab width (4 x 128-lane groups)
DEFAULT_TB = 1024                 # batch tile (multiple of 32 = int8 sublane tile)

# Packed layout of the 10 sign vectors inside the (TB, 512) int8 slab, listed
# in the original torch order (layers 1-5 then 7-11): (lane offset, width).
#   group 0: layer1  (128)
#   group 1: layer2..5 + layer7 (64+32+16+8+8 = 128)
#   group 2: layer8..10 (16+32+64 = 112) + 16 pad lanes
#   group 3: layer11 (128)
SIGN_WIDTHS = [128, 64, 32, 16, 8, 8, 16, 32, 64, 128]
SS_OFFSETS = [0, 128, 192, 224, 240, 248, 256, 272, 304, 384]
_GROUP_FLUSH = {0: 0, 6: 1, 9: 2, 10: 3}   # layer index -> 128-lane group to store


def _round_up(n, m):
    return ((n + m - 1) // m) * m


def _choose_tb(batch, tb):
    """Batch tile: multiple of 32; >=2 grid steps when batch > 32 (so the v7x
    megacore actually splits the grid); never over-pad tiny batches."""
    tb = _round_up(max(min(tb, 4096), 32), 32)
    if batch <= 32:
        return 32
    return min(tb, _round_up(pl.cdiv(batch, 2), 32))


def _autoencoder_kernel(*refs):
    """refs = (x, w1..w12, b1..b12, xz_out, ss_out)."""
    x_ref = refs[0]
    w_refs = refs[1:1 + NUM_LAYERS]
    b_refs = refs[1 + NUM_LAYERS:1 + 2 * NUM_LAYERS]
    xz_ref = refs[1 + 2 * NUM_LAYERS]
    ss_ref = refs[2 + 2 * NUM_LAYERS]

    tb = x_ref.shape[0]
    h = x_ref[...]                                     # (TB, 2) f32
    z_col = None
    grp = []                                           # pending pre-ReLU sign slices
    for i in range(NUM_LAYERS):
        # bf16 operands, f32 MXU accumulation; bias add in f32.  Padded output
        # lanes stay exactly 0 (zero weight columns + zero bias lanes).
        h = jnp.dot(h.astype(jnp.bfloat16), w_refs[i][...],
                    preferred_element_type=jnp.float32)
        h = h + b_refs[i][...]                         # (TB, 128) f32
        if i == 5:
            z_col = h[:, 0:1]                          # bottleneck: no sign, no ReLU
        elif i == 11:
            # Merge reconstruction (lanes 0:2; remaining lanes of h are exactly
            # 0) with the bottleneck z placed in lane 2 -> one narrow output.
            lane8 = jax.lax.broadcasted_iota(jnp.int32, (1, 8), 1)
            z_at_lane2 = z_col * (lane8 == 2).astype(jnp.float32)   # (TB, 8)
            xz_ref[...] = h[:, 0:8] + z_at_lane2
        else:
            # torch: bool(sign(x) + 1) == (x >= 0).
            grp.append(h[:, :DIMS[i + 1]])             # pre-ReLU f32 slice
            if i in _GROUP_FLUSH:
                g = _GROUP_FLUSH[i]
                if g == 2:                             # 112 real lanes -> pad to 128
                    grp.append(jnp.zeros((tb, 16), jnp.float32))
                cat = grp[0] if len(grp) == 1 else jnp.concatenate(grp, axis=1)
                ss_ref[:, g * LANE:(g + 1) * LANE] = (cat >= 0.0).astype(jnp.int8)
                grp = []
            h = jnp.maximum(h, 0.0)


def _pad_params(weights, biases):
    """Zero-pad weights to (in_pad, 128) bf16 and biases to (1, 128) f32."""
    w_pad, b_pad = [], []
    for i in range(NUM_LAYERS):
        fan_in, fan_out = DIMS[i], DIMS[i + 1]
        in_pad = fan_in if i == 0 else LANE
        wp = jnp.zeros((in_pad, LANE), jnp.float32)
        wp = wp.at[:fan_in, :fan_out].set(jnp.asarray(weights[i], jnp.float32))
        w_pad.append(wp.astype(jnp.bfloat16))
        bp = jnp.zeros((1, LANE), jnp.float32)
        bp = bp.at[:, :fan_out].set(
            jnp.asarray(biases[i], jnp.float32).reshape(1, fan_out))
        b_pad.append(bp)
    return w_pad, b_pad


def autoencoder_forward(x, weights, biases, *, tb=DEFAULT_TB):
    """x: (B, 2). weights[i]: (in, out). biases[i]: (1, out).

    Returns (x_recon (B,2) f32, z (B,1) f32, ss (B,496) bool) like torch forward.
    """
    B = x.shape[0]
    TB = _choose_tb(B, tb)
    B_pad = _round_up(B, TB)
    x_p = jnp.pad(x.astype(jnp.float32), ((0, B_pad - B), (0, 0)))
    w_pad, b_pad = _pad_params(weights, biases)

    grid = (B_pad // TB,)

    def const_spec(shape):
        # Resident across grid steps (constant block index).  Pallas still
        # double-buffers these, but in bf16 the total is < 1 MiB on every gen,
        # so we skip pipeline_mode tuning.
        return pl.BlockSpec(shape, lambda i: (0,) * len(shape))

    in_specs = (
        [pl.BlockSpec((TB, DIMS[0]), lambda i: (i, 0))]
        + [const_spec(w.shape) for w in w_pad]
        + [const_spec(b.shape) for b in b_pad]
    )
    out_specs = (
        pl.BlockSpec((TB, 8), lambda i: (i, 0)),           # merged x_recon + z
        pl.BlockSpec((TB, SS_LANES), lambda i: (i, 0)),    # packed sign bitmap
    )
    out_shape = (
        jax.ShapeDtypeStruct((B_pad, 8), jnp.float32),
        jax.ShapeDtypeStruct((B_pad, SS_LANES), jnp.int8),
    )

    # Honest (unpadded) cost hint for the XLA scheduler.
    real_macs = sum(DIMS[i] * DIMS[i + 1] for i in range(NUM_LAYERS))
    flops = 2 * B_pad * real_macs
    bytes_accessed = (
        4 * B_pad * DIMS[0]
        + 2 * sum(int(w.size) for w in w_pad)          # bf16 weights
        + 4 * sum(int(b.size) for b in b_pad)          # f32 biases
        + 4 * B_pad * 8                                # merged xz output
        + B_pad * SS_LANES                             # int8 packed signs
    )

    xz, ss_pack = pl.pallas_call(
        _autoencoder_kernel,
        out_shape=out_shape,
        grid=grid,
        in_specs=in_specs,
        out_specs=out_specs,
        compiler_params=pltpu.CompilerParams(
            dimension_semantics=("parallel",),
            vmem_limit_bytes=32 * 1024 * 1024,
        ),
        cost_estimate=pl.CostEstimate(
            flops=int(flops), transcendentals=0, bytes_accessed=int(bytes_accessed)
        ),
    )(x_p, *w_pad, *b_pad)

    x_out = xz[:B, 0:2]
    z_out = xz[:B, 2:3]
    ss = jnp.concatenate(
        [ss_pack[:B, off:off + w] for off, w in zip(SS_OFFSETS, SIGN_WIDTHS)],
        axis=1,
    ).astype(jnp.bool_)
    return x_out, z_out, ss


def init_params(key):
    """Deterministic PyTorch-Linear-style init: U(-1/sqrt(fan_in), 1/sqrt(fan_in))."""
    weights, biases = [], []
    for i in range(NUM_LAYERS):
        key, kw, kb = jax.random.split(key, 3)
        fan_in, fan_out = DIMS[i], DIMS[i + 1]
        bound = 1.0 / np.sqrt(fan_in)
        weights.append(
            jax.random.uniform(kw, (fan_in, fan_out), jnp.float32, -bound, bound))
        biases.append(
            jax.random.uniform(kb, (1, fan_out), jnp.float32, -bound, bound))
    return weights, biases


def reference_forward(x, weights, biases):
    """Pure-JAX reference mirroring the kernel's padded bf16/f32 math and the
    torch forward's control flow exactly."""
    w_pad, b_pad = _pad_params(weights, biases)
    h = jnp.asarray(x, jnp.float32)
    signs, z = [], None
    for i in range(NUM_LAYERS):
        h = jnp.dot(h.astype(jnp.bfloat16), w_pad[i],
                    preferred_element_type=jnp.float32) + b_pad[i]
        if i == 5:
            z = h[:, 0:1]
        elif i == 11:
            pass
        else:
            signs.append(h[:, :DIMS[i + 1]] >= 0.0)
            h = jnp.maximum(h, 0.0)
    return h[:, 0:2], z, jnp.concatenate(signs, axis=1)


if __name__ == "__main__":
    key = jax.random.PRNGKey(0)
    key, kp, kx = jax.random.split(key, 3)
    weights, biases = init_params(kp)

    B = 40                                  # small; exercises >1 grid step + batch pad
    x = jax.random.normal(kx, (B, DIMS[0]), jnp.float32)

    x_out, z_out, ss = autoencoder_forward(x, weights, biases)
    jax.block_until_ready((x_out, z_out, ss))

    # Sanity check against a pure-JAX reference that uses the same bf16/f32 math.
    xr, zr, ssr = reference_forward(x, weights, biases)
    np.testing.assert_allclose(np.asarray(x_out), np.asarray(xr), rtol=1e-3, atol=1e-3)
    np.testing.assert_allclose(np.asarray(z_out), np.asarray(zr), rtol=1e-3, atol=1e-3)
    mismatch = float(jnp.mean((ss != ssr).astype(jnp.float32)))
    assert mismatch <= 5e-3                 # tolerate rare bf16 boundary sign flips
    assert x_out.shape == (B, 2) and z_out.shape == (B, 1) and ss.shape == (B, 496)
    assert ss.dtype == jnp.bool_

    print("KERNEL_OK")
</pallas_src>

<mosaic_0001>
module attributes {stable_mosaic.version = 11 : i64} {
  func.func @_autoencoder_kernel(%arg0: i32, %arg1: memref<32x2xf32, #tpu.memory_space<vmem>>, %arg2: memref<2x128xbf16, #tpu.memory_space<vmem>>, %arg3: memref<128x128xbf16, #tpu.memory_space<vmem>>, %arg4: memref<128x128xbf16, #tpu.memory_space<vmem>>, %arg5: memref<128x128xbf16, #tpu.memory_space<vmem>>, %arg6: memref<128x128xbf16, #tpu.memory_space<vmem>>, %arg7: memref<128x128xbf16, #tpu.memory_space<vmem>>, %arg8: memref<128x128xbf16, #tpu.memory_space<vmem>>, %arg9: memref<128x128xbf16, #tpu.memory_space<vmem>>, %arg10: memref<128x128xbf16, #tpu.memory_space<vmem>>, %arg11: memref<128x128xbf16, #tpu.memory_space<vmem>>, %arg12: memref<128x128xbf16, #tpu.memory_space<vmem>>, %arg13: memref<128x128xbf16, #tpu.memory_space<vmem>>, %arg14: memref<1x128xf32, #tpu.memory_space<vmem>>, %arg15: memref<1x128xf32, #tpu.memory_space<vmem>>, %arg16: memref<1x128xf32, #tpu.memory_space<vmem>>, %arg17: memref<1x128xf32, #tpu.memory_space<vmem>>, %arg18: memref<1x128xf32, #tpu.memory_space<vmem>>, %arg19: memref<1x128xf32, #tpu.memory_space<vmem>>, %arg20: memref<1x128xf32, #tpu.memory_space<vmem>>, %arg21: memref<1x128xf32, #tpu.memory_space<vmem>>, %arg22: memref<1x128xf32, #tpu.memory_space<vmem>>, %arg23: memref<1x128xf32, #tpu.memory_space<vmem>>, %arg24: memref<1x128xf32, #tpu.memory_space<vmem>>, %arg25: memref<1x128xf32, #tpu.memory_space<vmem>>, %arg26: memref<32x8xf32, #tpu.memory_space<vmem>>, %arg27: memref<32x512xi8, #tpu.memory_space<vmem>>) attributes {dimension_semantics = [#tpu.dimension_semantics<parallel>], iteration_bounds = array<i64: 2>, scalar_prefetch = 0 : i64, scratch_operands = 0 : i64, tpu.core_type = #tpu.core_type<tc>, window_params = [{transform_indices = @transform_0, window_bounds = array<i64: 32, 2>}, {pipeline_mode = #tpu.pipeline_mode<synchronous>, transform_indices = @transform_1, window_bounds = array<i64: 2, 128>}, {pipeline_mode = #tpu.pipeline_mode<synchronous>, transform_indices = @transform_2, window_bounds = array<i64: 128, 128>}, {pipeline_mode = #tpu.pipeline_mode<synchronous>, transform_indices = @transform_3, window_bounds = array<i64: 128, 128>}, {pipeline_mode = #tpu.pipeline_mode<synchronous>, transform_indices = @transform_4, window_bounds = array<i64: 128, 128>}, {pipeline_mode = #tpu.pipeline_mode<synchronous>, transform_indices = @transform_5, window_bounds = array<i64: 128, 128>}, {pipeline_mode = #tpu.pipeline_mode<synchronous>, transform_indices = @transform_6, window_bounds = array<i64: 128, 128>}, {pipeline_mode = #tpu.pipeline_mode<synchronous>, transform_indices = @transform_7, window_bounds = array<i64: 128, 128>}, {pipeline_mode = #tpu.pipeline_mode<synchronous>, transform_indices = @transform_8, window_bounds = array<i64: 128, 128>}, {pipeline_mode = #tpu.pipeline_mode<synchronous>, transform_indices = @transform_9, window_bounds = array<i64: 128, 128>}, {pipeline_mode = #tpu.pipeline_mode<synchronous>, transform_indices = @transform_10, window_bounds = array<i64: 128, 128>}, {pipeline_mode = #tpu.pipeline_mode<synchronous>, transform_indices = @transform_11, window_bounds = array<i64: 128, 128>}, {pipeline_mode = #tpu.pipeline_mode<synchronous>, transform_indices = @transform_12, window_bounds = array<i64: 128, 128>}, {pipeline_mode = #tpu.pipeline_mode<synchronous>, transform_indices = @transform_13, window_bounds = array<i64: 1, 128>}, {pipeline_mode = #tpu.pipeline_mode<synchronous>, transform_indices = @transform_14, window_bounds = array<i64: 1, 128>}, {pipeline_mode = #tpu.pipeline_mode<synchronous>, transform_indices = @transform_15, window_bounds = array<i64: 1, 128>}, {pipeline_mode = #tpu.pipeline_mode<synchronous>, transform_indices = @transform_16, window_bounds = array<i64: 1, 128>}, {pipeline_mode = #tpu.pipeline_mode<synchronous>, transform_indices = @transform_17, window_bounds = array<i64: 1, 128>}, {pipeline_mode = #tpu.pipeline_mode<synchronous>, transform_indices = @transform_18, window_bounds = array<i64: 1, 128>}, {pipeline_mode = #tpu.pipeline_mode<synchronous>, transform_indices = @transform_19, window_bounds = array<i64: 1, 128>}, {pipeline_mode = #tpu.pipeline_mode<synchronous>, transform_indices = @transform_20, window_bounds = array<i64: 1, 128>}, {pipeline_mode = #tpu.pipeline_mode<synchronous>, transform_indices = @transform_21, window_bounds = array<i64: 1, 128>}, {pipeline_mode = #tpu.pipeline_mode<synchronous>, transform_indices = @transform_22, window_bounds = array<i64: 1, 128>}, {pipeline_mode = #tpu.pipeline_mode<synchronous>, transform_indices = @transform_23, window_bounds = array<i64: 1, 128>}, {pipeline_mode = #tpu.pipeline_mode<synchronous>, transform_indices = @transform_24, window_bounds = array<i64: 1, 128>}, {transform_indices = @transform_25, window_bounds = array<i64: 32, 8>}, {transform_indices = @transform_26, window_bounds = array<i64: 32, 512>}]} {
    %c0 = arith.constant 0 : index
    %c0_0 = arith.constant 0 : index
    %0 = vector.load %arg1[%c0, %c0_0] : memref<32x2xf32, #tpu.memory_space<vmem>>, vector<32x2xf32>
    %1 = arith.truncf %0 : vector<32x2xf32> to vector<32x2xbf16>
    %c0_1 = arith.constant 0 : index
    %c0_2 = arith.constant 0 : index
    %2 = vector.load %arg2[%c0_1, %c0_2] : memref<2x128xbf16, #tpu.memory_space<vmem>>, vector<2x128xbf16>
    %cst = arith.constant dense<0.000000e+00> : vector<32x128xf32>
    %3 = tpu.matmul %1, %2, %cst {dimension_numbers = #tpu.dot_dimension_numbers<[1], [0], [0], [1], [0, 0, 1, 1], [], []>} : vector<32x2xbf16>, vector<2x128xbf16>, vector<32x128xf32> -> vector<32x128xf32>
    %c0_3 = arith.constant 0 : index
    %c0_4 = arith.constant 0 : index
    %4 = vector.load %arg14[%c0_3, %c0_4] : memref<1x128xf32, #tpu.memory_space<vmem>>, vector<1x128xf32>
    %5 = vector.broadcast %4 : vector<1x128xf32> to vector<32x128xf32>
    %6 = arith.addf %3, %5 : vector<32x128xf32>
    %cst_5 = arith.constant 0.000000e+00 : f32
    %7 = vector.broadcast %cst_5 : f32 to vector<32x128xf32>
    %8 = arith.cmpf oge, %6, %7 : vector<32x128xf32>
    %9 = arith.extui %8 : vector<32x128xi1> to vector<32x128xi8>
    %c0_6 = arith.constant 0 : index
    %c0_7 = arith.constant 0 : index
    %10 = vector.load %arg27[%c0_6, %c0_7] : memref<32x512xi8, #tpu.memory_space<vmem>>, vector<32x128xi8>
    tpu.vector_store %arg27[%c0_6, %c0_7], %9 {strides = array<i32>} : memref<32x512xi8, #tpu.memory_space<vmem>>, vector<32x128xi8>,
    %cst_8 = arith.constant 0.000000e+00 : f32
    %11 = vector.broadcast %cst_8 : f32 to vector<32x128xf32>
    %12 = arith.maximumf %6, %11 : vector<32x128xf32>
    %13 = arith.truncf %12 : vector<32x128xf32> to vector<32x128xbf16>
    %c0_9 = arith.constant 0 : index
    %c0_10 = arith.constant 0 : index
    %14 = vector.load %arg3[%c0_9, %c0_10] : memref<128x128xbf16, #tpu.memory_space<vmem>>, vector<128x128xbf16>
    %cst_11 = arith.constant dense<0.000000e+00> : vector<32x128xf32>
    %15 = tpu.matmul %13, %14, %cst_11 {dimension_numbers = #tpu.dot_dimension_numbers<[1], [0], [0], [1], [0, 0, 1, 1], [], []>} : vector<32x128xbf16>, vector<128x128xbf16>, vector<32x128xf32> -> vector<32x128xf32>
    %c0_12 = arith.constant 0 : index
    %c0_13 = arith.constant 0 : index
    %16 = vector.load %arg15[%c0_12, %c0_13] : memref<1x128xf32, #tpu.memory_space<vmem>>, vector<1x128xf32>
    %17 = vector.broadcast %16 : vector<1x128xf32> to vector<32x128xf32>
    %18 = arith.addf %15, %17 : vector<32x128xf32>
    %19 = vector.extract_strided_slice %18 {offsets = [0, 0], sizes = [32, 64], strides = [1, 1]} : vector<32x128xf32> to vector<32x64xf32>
    %cst_14 = arith.constant 0.000000e+00 : f32
    %20 = vector.broadcast %cst_14 : f32 to vector<32x128xf32>
    %21 = arith.maximumf %18, %20 : vector<32x128xf32>
    %22 = arith.truncf %21 : vector<32x128xf32> to vector<32x128xbf16>
    %c0_15 = arith.constant 0 : index
    %c0_16 = arith.constant 0 : index
    %23 = vector.load %arg4[%c0_15, %c0_16] : memref<128x128xbf16, #tpu.memory_space<vmem>>, vector<128x128xbf16>
    %cst_17 = arith.constant dense<0.000000e+00> : vector<32x128xf32>
    %24 = tpu.matmul %22, %23, %cst_17 {dimension_numbers = #tpu.dot_dimension_numbers<[1], [0], [0], [1], [0, 0, 1, 1], [], []>} : vector<32x128xbf16>, vector<128x128xbf16>, vector<32x128xf32> -> vector<32x128xf32>
    %c0_18 = arith.constant 0 : index
    %c0_19 = arith.constant 0 : index
    %25 = vector.load %arg16[%c0_18, %c0_19] : memref<1x128xf32, #tpu.memory_space<vmem>>, vector<1x128xf32>
    %26 = vector.broadcast %25 : vector<1x128xf32> to vector<32x128xf32>
    %27 = arith.addf %24, %26 : vector<32x128xf32>
    %28 = vector.extract_strided_slice %27 {offsets = [0, 0], sizes = [32, 32], strides = [1, 1]} : vector<32x128xf32> to vector<32x32xf32>
    %cst_20 = arith.constant 0.000000e+00 : f32
    %29 = vector.broadcast %cst_20 : f32 to vector<32x128xf32>
    %30 = arith.maximumf %27, %29 : vector<32x128xf32>
    %31 = arith.truncf %30 : vector<32x128xf32> to vector<32x128xbf16>
    %c0_21 = arith.constant 0 : index
    %c0_22 = arith.constant 0 : index
    %32 = vector.load %arg5[%c0_21, %c0_22] : memref<128x128xbf16, #tpu.memory_space<vmem>>, vector<128x128xbf16>
    %cst_23 = arith.constant dense<0.000000e+00> : vector<32x128xf32>
    %33 = tpu.matmul %31, %32, %cst_23 {dimension_numbers = #tpu.dot_dimension_numbers<[1], [0], [0], [1], [0, 0, 1, 1], [], []>} : vector<32x128xbf16>, vector<128x128xbf16>, vector<32x128xf32> -> vector<32x128xf32>
    %c0_24 = arith.constant 0 : index
    %c0_25 = arith.constant 0 : index
    %34 = vector.load %arg17[%c0_24, %c0_25] : memref<1x128xf32, #tpu.memory_space<vmem>>, vector<1x128xf32>
    %35 = vector.broadcast %34 : vector<1x128xf32> to vector<32x128xf32>
    %36 = arith.addf %33, %35 : vector<32x128xf32>
    %37 = vector.extract_strided_slice %36 {offsets = [0, 0], sizes = [32, 16], strides = [1, 1]} : vector<32x128xf32> to vector<32x16xf32>
    %cst_26 = arith.constant 0.000000e+00 : f32
    %38 = vector.broadcast %cst_26 : f32 to vector<32x128xf32>
    %39 = arith.maximumf %36, %38 : vector<32x128xf32>
    %40 = arith.truncf %39 : vector<32x128xf32> to vector<32x128xbf16>
    %c0_27 = arith.constant 0 : index
    %c0_28 = arith.constant 0 : index
    %41 = vector.load %arg6[%c0_27, %c0_28] : memref<128x128xbf16, #tpu.memory_space<vmem>>, vector<128x128xbf16>
    %cst_29 = arith.constant dense<0.000000e+00> : vector<32x128xf32>
    %42 = tpu.matmul %40, %41, %cst_29 {dimension_numbers = #tpu.dot_dimension_numbers<[1], [0], [0], [1], [0, 0, 1, 1], [], []>} : vector<32x128xbf16>, vector<128x128xbf16>, vector<32x128xf32> -> vector<32x128xf32>
    %c0_30 = arith.constant 0 : index
    %c0_31 = arith.constant 0 : index
    %43 = vector.load %arg18[%c0_30, %c0_31] : memref<1x128xf32, #tpu.memory_space<vmem>>, vector<1x128xf32>
    %44 = vector.broadcast %43 : vector<1x128xf32> to vector<32x128xf32>
    %45 = arith.addf %42, %44 : vector<32x128xf32>
    %46 = vector.extract_strided_slice %45 {offsets = [0, 0], sizes = [32, 8], strides = [1, 1]} : vector<32x128xf32> to vector<32x8xf32>
    %cst_32 = arith.constant 0.000000e+00 : f32
    %47 = vector.broadcast %cst_32 : f32 to vector<32x128xf32>
    %48 = arith.maximumf %45, %47 : vector<32x128xf32>
    %49 = arith.truncf %48 : vector<32x128xf32> to vector<32x128xbf16>
    %c0_33 = arith.constant 0 : index
    %c0_34 = arith.constant 0 : index
    %50 = vector.load %arg7[%c0_33, %c0_34] : memref<128x128xbf16, #tpu.memory_space<vmem>>, vector<128x128xbf16>
    %cst_35 = arith.constant dense<0.000000e+00> : vector<32x128xf32>
    %51 = tpu.matmul %49, %50, %cst_35 {dimension_numbers = #tpu.dot_dimension_numbers<[1], [0], [0], [1], [0, 0, 1, 1], [], []>} : vector<32x128xbf16>, vector<128x128xbf16>, vector<32x128xf32> -> vector<32x128xf32>
    %c0_36 = arith.constant 0 : index
    %c0_37 = arith.constant 0 : index
    %52 = vector.load %arg19[%c0_36, %c0_37] : memref<1x128xf32, #tpu.memory_space<vmem>>, vector<1x128xf32>
    %53 = vector.broadcast %52 : vector<1x128xf32> to vector<32x128xf32>
    %54 = arith.addf %51, %53 : vector<32x128xf32>
    %55 = vector.extract_strided_slice %54 {offsets = [0, 0], sizes = [32, 1], strides = [1, 1]} : vector<32x128xf32> to vector<32x1xf32>
    %56 = arith.truncf %54 : vector<32x128xf32> to vector<32x128xbf16>
    %c0_38 = arith.constant 0 : index
    %c0_39 = arith.constant 0 : index
    %57 = vector.load %arg8[%c0_38, %c0_39] : memref<128x128xbf16, #tpu.memory_space<vmem>>, vector<128x128xbf16>
    %cst_40 = arith.constant dense<0.000000e+00> : vector<32x128xf32>
    %58 = tpu.matmul %56, %57, %cst_40 {dimension_numbers = #tpu.dot_dimension_numbers<[1], [0], [0], [1], [0, 0, 1, 1], [], []>} : vector<32x128xbf16>, vector<128x128xbf16>, vector<32x128xf32> -> vector<32x128xf32>
    %c0_41 = arith.constant 0 : index
    %c0_42 = arith.constant 0 : index
    %59 = vector.load %arg20[%c0_41, %c0_42] : memref<1x128xf32, #tpu.memory_space<vmem>>, vector<1x128xf32>
    %60 = vector.broadcast %59 : vector<1x128xf32> to vector<32x128xf32>
    %61 = arith.addf %58, %60 : vector<32x128xf32>
    %62 = vector.extract_strided_slice %61 {offsets = [0, 0], sizes = [32, 8], strides = [1, 1]} : vector<32x128xf32> to vector<32x8xf32>
    %63 = tpu.concatenate %19, %28, %37, %46, %62 in 1 : vector<32x64xf32>, vector<32x32xf32>, vector<32x16xf32>, vector<32x8xf32>, vector<32x8xf32> -> vector<32x128xf32>
    %cst_43 = arith.constant 0.000000e+00 : f32
    %64 = vector.broadcast %cst_43 : f32 to vector<32x128xf32>
    %65 = arith.cmpf oge, %63, %64 : vector<32x128xf32>
    %66 = arith.extui %65 : vector<32x128xi1> to vector<32x128xi8>
    %c0_44 = arith.constant 0 : index
    %c128 = arith.constant 128 : index
    %67 = vector.load %arg27[%c0_44, %c128] : memref<32x512xi8, #tpu.memory_space<vmem>>, vector<32x128xi8>
    tpu.vector_store %arg27[%c0_44, %c128], %66 {strides = array<i32>} : memref<32x512xi8, #tpu.memory_space<vmem>>, vector<32x128xi8>,
    %cst_45 = arith.constant 0.000000e+00 : f32
    %68 = vector.broadcast %cst_45 : f32 to vector<32x128xf32>
    %69 = arith.maximumf %61, %68 : vector<32x128xf32>
    %70 = arith.truncf %69 : vector<32x128xf32> to vector<32x128xbf16>
    %c0_46 = arith.constant 0 : index
    %c0_47 = arith.constant 0 : index
    %71 = vector.load %arg9[%c0_46, %c0_47] : memref<128x128xbf16, #tpu.memory_space<vmem>>, vector<128x128xbf16>
    %cst_48 = arith.constant dense<0.000000e+00> : vector<32x128xf32>
    %72 = tpu.matmul %70, %71, %cst_48 {dimension_numbers = #tpu.dot_dimension_numbers<[1], [0], [0], [1], [0, 0, 1, 1], [], []>} : vector<32x128xbf16>, vector<128x128xbf16>, vector<32x128xf32> -> vector<32x128xf32>
    %c0_49 = arith.constant 0 : index
    %c0_50 = arith.constant 0 : index
    %73 = vector.load %arg21[%c0_49, %c0_50] : memref<1x128xf32, #tpu.memory_space<vmem>>, vector<1x128xf32>
    %74 = vector.broadcast %73 : vector<1x128xf32> to vector<32x128xf32>
    %75 = arith.addf %72, %74 : vector<32x128xf32>
    %76 = vector.extract_strided_slice %75 {offsets = [0, 0], sizes = [32, 16], strides = [1, 1]} : vector<32x128xf32> to vector<32x16xf32>
    %cst_51 = arith.constant 0.000000e+00 : f32
    %77 = vector.broadcast %cst_51 : f32 to vector<32x128xf32>
    %78 = arith.maximumf %75, %77 : vector<32x128xf32>
    %79 = arith.truncf %78 : vector<32x128xf32> to vector<32x128xbf16>
    %c0_52 = arith.constant 0 : index
    %c0_53 = arith.constant 0 : index
    %80 = vector.load %arg10[%c0_52, %c0_53] : memref<128x128xbf16, #tpu.memory_space<vmem>>, vector<128x128xbf16>
    %cst_54 = arith.constant dense<0.000000e+00> : vector<32x128xf32>
    %81 = tpu.matmul %79, %80, %cst_54 {dimension_numbers = #tpu.dot_dimension_numbers<[1], [0], [0], [1], [0, 0, 1, 1], [], []>} : vector<32x128xbf16>, vector<128x128xbf16>, vector<32x128xf32> -> vector<32x128xf32>
    %c0_55 = arith.constant 0 : index
    %c0_56 = arith.constant 0 : index
    %82 = vector.load %arg22[%c0_55, %c0_56] : memref<1x128xf32, #tpu.memory_space<vmem>>, vector<1x128xf32>
    %83 = vector.broadcast %82 : vector<1x128xf32> to vector<32x128xf32>
    %84 = arith.addf %81, %83 : vector<32x128xf32>
    %85 = vector.extract_strided_slice %84 {offsets = [0, 0], sizes = [32, 32], strides = [1, 1]} : vector<32x128xf32> to vector<32x32xf32>
    %cst_57 = arith.constant 0.000000e+00 : f32
    %86 = vector.broadcast %cst_57 : f32 to vector<32x128xf32>
    %87 = arith.maximumf %84, %86 : vector<32x128xf32>
    %88 = arith.truncf %87 : vector<32x128xf32> to vector<32x128xbf16>
    %c0_58 = arith.constant 0 : index
    %c0_59 = arith.constant 0 : index
    %89 = vector.load %arg11[%c0_58, %c0_59] : memref<128x128xbf16, #tpu.memory_space<vmem>>, vector<128x128xbf16>
    %cst_60 = arith.constant dense<0.000000e+00> : vector<32x128xf32>
    %90 = tpu.matmul %88, %89, %cst_60 {dimension_numbers = #tpu.dot_dimension_numbers<[1], [0], [0], [1], [0, 0, 1, 1], [], []>} : vector<32x128xbf16>, vector<128x128xbf16>, vector<32x128xf32> -> vector<32x128xf32>
    %c0_61 = arith.constant 0 : index
    %c0_62 = arith.constant 0 : index
    %91 = vector.load %arg23[%c0_61, %c0_62] : memref<1x128xf32, #tpu.memory_space<vmem>>, vector<1x128xf32>
    %92 = vector.broadcast %91 : vector<1x128xf32> to vector<32x128xf32>
    %93 = arith.addf %90, %92 : vector<32x128xf32>
    %94 = vector.extract_strided_slice %93 {offsets = [0, 0], sizes = [32, 64], strides = [1, 1]} : vector<32x128xf32> to vector<32x64xf32>
    %cst_63 = arith.constant 0.000000e+00 : f32
    %95 = vector.broadcast %cst_63 : f32 to vector<32x16xf32>
    %96 = tpu.concatenate %76, %85, %94, %95 in 1 : vector<32x16xf32>, vector<32x32xf32>, vector<32x64xf32>, vector<32x16xf32> -> vector<32x128xf32>
    %cst_64 = arith.constant 0.000000e+00 : f32
    %97 = vector.broadcast %cst_64 : f32 to vector<32x128xf32>
    %98 = arith.cmpf oge, %96, %97 : vector<32x128xf32>
    %99 = arith.extui %98 : vector<32x128xi1> to vector<32x128xi8>
    %c0_65 = arith.constant 0 : index
    %c256 = arith.constant 256 : index
    %100 = vector.load %arg27[%c0_65, %c256] : memref<32x512xi8, #tpu.memory_space<vmem>>, vector<32x128xi8>
    tpu.vector_store %arg27[%c0_65, %c256], %99 {strides = array<i32>} : memref<32x512xi8, #tpu.memory_space<vmem>>, vector<32x128xi8>,
    %cst_66 = arith.constant 0.000000e+00 : f32
    %101 = vector.broadcast %cst_66 : f32 to vector<32x128xf32>
    %102 = arith.maximumf %93, %101 : vector<32x128xf32>
    %103 = arith.truncf %102 : vector<32x128xf32> to vector<32x128xbf16>
    %c0_67 = arith.constant 0 : index
    %c0_68 = arith.constant 0 : index
    %104 = vector.load %arg12[%c0_67, %c0_68] : memref<128x128xbf16, #tpu.memory_space<vmem>>, vector<128x128xbf16>
    %cst_69 = arith.constant dense<0.000000e+00> : vector<32x128xf32>
    %105 = tpu.matmul %103, %104, %cst_69 {dimension_numbers = #tpu.dot_dimension_numbers<[1], [0], [0], [1], [0, 0, 1, 1], [], []>} : vector<32x128xbf16>, vector<128x128xbf16>, vector<32x128xf32> -> vector<32x128xf32>
    %c0_70 = arith.constant 0 : index
    %c0_71 = arith.constant 0 : index
    %106 = vector.load %arg24[%c0_70, %c0_71] : memref<1x128xf32, #tpu.memory_space<vmem>>, vector<1x128xf32>
    %107 = vector.broadcast %106 : vector<1x128xf32> to vector<32x128xf32>
    %108 = arith.addf %105, %107 : vector<32x128xf32>
    %cst_72 = arith.constant 0.000000e+00 : f32
    %109 = vector.broadcast %cst_72 : f32 to vector<32x128xf32>
    %110 = arith.cmpf oge, %108, %109 : vector<32x128xf32>
    %111 = arith.extui %110 : vector<32x128xi1> to vector<32x128xi8>
    %c0_73 = arith.constant 0 : index
    %c384 = arith.constant 384 : index
    %112 = vector.load %arg27[%c0_73, %c384] : memref<32x512xi8, #tpu.memory_space<vmem>>, vector<32x128xi8>
    tpu.vector_store %arg27[%c0_73, %c384], %111 {strides = array<i32>} : memref<32x512xi8, #tpu.memory_space<vmem>>, vector<32x128xi8>,
    %cst_74 = arith.constant 0.000000e+00 : f32
    %113 = vector.broadcast %cst_74 : f32 to vector<32x128xf32>
    %114 = arith.maximumf %108, %113 : vector<32x128xf32>
    %115 = arith.truncf %114 : vector<32x128xf32> to vector<32x128xbf16>
    %c0_75 = arith.constant 0 : index
    %c0_76 = arith.constant 0 : index
    %116 = vector.load %arg13[%c0_75, %c0_76] : memref<128x128xbf16, #tpu.memory_space<vmem>>, vector<128x128xbf16>
    %cst_77 = arith.constant dense<0.000000e+00> : vector<32x128xf32>
    %117 = tpu.matmul %115, %116, %cst_77 {dimension_numbers = #tpu.dot_dimension_numbers<[1], [0], [0], [1], [0, 0, 1, 1], [], []>} : vector<32x128xbf16>, vector<128x128xbf16>, vector<32x128xf32> -> vector<32x128xf32>
    %c0_78 = arith.constant 0 : index
    %c0_79 = arith.constant 0 : index
    %118 = vector.load %arg25[%c0_78, %c0_79] : memref<1x128xf32, #tpu.memory_space<vmem>>, vector<1x128xf32>
    %119 = vector.broadcast %118 : vector<1x128xf32> to vector<32x128xf32>
    %120 = arith.addf %117, %119 : vector<32x128xf32>
    %121 = tpu.iota {dimensions = array<i32: 1>} : vector<1x8xi32>
    %c2_i32 = arith.constant 2 : i32
    %122 = vector.broadcast %c2_i32 : i32 to vector<1x8xi32>
    %123 = arith.cmpi eq, %121, %122 : vector<1x8xi32>
    %124 = arith.extui %123 : vector<1x8xi1> to vector<1x8xi32>
    %125 = arith.sitofp %124 : vector<1x8xi32> to vector<1x8xf32>
    %126 = vector.broadcast %55 : vector<32x1xf32> to vector<32x8xf32>
    %127 = vector.broadcast %125 : vector<1x8xf32> to vector<32x8xf32>
    %128 = arith.mulf %126, %127 : vector<32x8xf32>
    %129 = vector.extract_strided_slice %120 {offsets = [0, 0], sizes = [32, 8], strides = [1, 1]} : vector<32x128xf32> to vector<32x8xf32>
    %130 = arith.addf %129, %128 : vector<32x8xf32>
    %c0_80 = arith.constant 0 : index
    %c0_81 = arith.constant 0 : index
    %131 = vector.load %arg26[%c0_80, %c0_81] : memref<32x8xf32, #tpu.memory_space<vmem>>, vector<32x8xf32>
    tpu.vector_store %arg26[%c0_80, %c0_81], %130 {strides = array<i32>} : memref<32x8xf32, #tpu.memory_space<vmem>>, vector<32x8xf32>,
    return
  }
  func.func @transform_0(%arg0: i32) -> (i32, i32) {
    %c0_i32 = arith.constant 0 : i32
    %c0_i32_0 = arith.constant 0 : i32
    return %arg0, %c0_i32 : i32, i32
  }
  func.func @transform_1(%arg0: i32) -> (i32, i32) {
    %c0_i32 = arith.constant 0 : i32
    %c0_i32_0 = arith.constant 0 : i32
    %c0_i32_1 = arith.constant 0 : i32
    return %c0_i32, %c0_i32_0 : i32, i32
  }
  func.func @transform_2(%arg0: i32) -> (i32, i32) {
    %c0_i32 = arith.constant 0 : i32
    %c0_i32_0 = arith.constant 0 : i32
    %c0_i32_1 = arith.constant 0 : i32
    return %c0_i32, %c0_i32_0 : i32, i32
  }
  func.func @transform_3(%arg0: i32) -> (i32, i32) {
    %c0_i32 = arith.constant 0 : i32
    %c0_i32_0 = arith.constant 0 : i32
    %c0_i32_1 = arith.constant 0 : i32
    return %c0_i32, %c0_i32_0 : i32, i32
  }
  func.func @transform_4(%arg0: i32) -> (i32, i32) {
    %c0_i32 = arith.constant 0 : i32
    %c0_i32_0 = arith.constant 0 : i32
    %c0_i32_1 = arith.constant 0 : i32
    return %c0_i32, %c0_i32_0 : i32, i32
  }
  func.func @transform_5(%arg0: i32) -> (i32, i32) {
    %c0_i32 = arith.constant 0 : i32
    %c0_i32_0 = arith.constant 0 : i32
    %c0_i32_1 = arith.constant 0 : i32
    return %c0_i32, %c0_i32_0 : i32, i32
  }
  func.func @transform_6(%arg0: i32) -> (i32, i32) {
    %c0_i32 = arith.constant 0 : i32
    %c0_i32_0 = arith.constant 0 : i32
    %c0_i32_1 = arith.constant 0 : i32
    return %c0_i32, %c0_i32_0 : i32, i32
  }
  func.func @transform_7(%arg0: i32) -> (i32, i32) {
    %c0_i32 = arith.constant 0 : i32
    %c0_i32_0 = arith.constant 0 : i32
    %c0_i32_1 = arith.constant 0 : i32
    return %c0_i32, %c0_i32_0 : i32, i32
  }
  func.func @transform_8(%arg0: i32) -> (i32, i32) {
    %c0_i32 = arith.constant 0 : i32
    %c0_i32_0 = arith.constant 0 : i32
    %c0_i32_1 = arith.constant 0 : i32
    return %c0_i32, %c0_i32_0 : i32, i32
  }
  func.func @transform_9(%arg0: i32) -> (i32, i32) {
    %c0_i32 = arith.constant 0 : i32
    %c0_i32_0 = arith.constant 0 : i32
    %c0_i32_1 = arith.constant 0 : i32
    return %c0_i32, %c0_i32_0 : i32, i32
  }
  func.func @transform_10(%arg0: i32) -> (i32, i32) {
    %c0_i32 = arith.constant 0 : i32
    %c0_i32_0 = arith.constant 0 : i32
    %c0_i32_1 = arith.constant 0 : i32
    return %c0_i32, %c0_i32_0 : i32, i32
  }
  func.func @transform_11(%arg0: i32) -> (i32, i32) {
    %c0_i32 = arith.constant 0 : i32
    %c0_i32_0 = arith.constant 0 : i32
    %c0_i32_1 = arith.constant 0 : i32
    return %c0_i32, %c0_i32_0 : i32, i32
  }
  func.func @transform_12(%arg0: i32) -> (i32, i32) {
    %c0_i32 = arith.constant 0 : i32
    %c0_i32_0 = arith.constant 0 : i32
    %c0_i32_1 = arith.constant 0 : i32
    return %c0_i32, %c0_i32_0 : i32, i32
  }
  func.func @transform_13(%arg0: i32) -> (i32, i32) {
    %c0_i32 = arith.constant 0 : i32
    %c0_i32_0 = arith.constant 0 : i32
    %c0_i32_1 = arith.constant 0 : i32
    return %c0_i32, %c0_i32_0 : i32, i32
  }
  func.func @transform_14(%arg0: i32) -> (i32, i32) {
    %c0_i32 = arith.constant 0 : i32
    %c0_i32_0 = arith.constant 0 : i32
    %c0_i32_1 = arith.constant 0 : i32
    return %c0_i32, %c0_i32_0 : i32, i32
  }
  func.func @transform_15(%arg0: i32) -> (i32, i32) {
    %c0_i32 = arith.constant 0 : i32
    %c0_i32_0 = arith.constant 0 : i32
    %c0_i32_1 = arith.constant 0 : i32
    return %c0_i32, %c0_i32_0 : i32, i32
  }
  func.func @transform_16(%arg0: i32) -> (i32, i32) {
    %c0_i32 = arith.constant 0 : i32
    %c0_i32_0 = arith.constant 0 : i32
    %c0_i32_1 = arith.constant 0 : i32
    return %c0_i32, %c0_i32_0 : i32, i32
  }
  func.func @transform_17(%arg0: i32) -> (i32, i32) {
    %c0_i32 = arith.constant 0 : i32
    %c0_i32_0 = arith.constant 0 : i32
    %c0_i32_1 = arith.constant 0 : i32
    return %c0_i32, %c0_i32_0 : i32, i32
  }
  func.func @transform_18(%arg0: i32) -> (i32, i32) {
    %c0_i32 = arith.constant 0 : i32
    %c0_i32_0 = arith.constant 0 : i32
    %c0_i32_1 = arith.constant 0 : i32
    return %c0_i32, %c0_i32_0 : i32, i32
  }
  func.func @transform_19(%arg0: i32) -> (i32, i32) {
    %c0_i32 = arith.constant 0 : i32
    %c0_i32_0 = arith.constant 0 : i32
    %c0_i32_1 = arith.constant 0 : i32
    return %c0_i32, %c0_i32_0 : i32, i32
  }
  func.func @transform_20(%arg0: i32) -> (i32, i32) {
    %c0_i32 = arith.constant 0 : i32
    %c0_i32_0 = arith.constant 0 : i32
    %c0_i32_1 = arith.constant 0 : i32
    return %c0_i32, %c0_i32_0 : i32, i32
  }
  func.func @transform_21(%arg0: i32) -> (i32, i32) {
    %c0_i32 = arith.constant 0 : i32
    %c0_i32_0 = arith.constant 0 : i32
    %c0_i32_1 = arith.constant 0 : i32
    return %c0_i32, %c0_i32_0 : i32, i32
  }
  func.func @transform_22(%arg0: i32) -> (i32, i32) {
    %c0_i32 = arith.constant 0 : i32
    %c0_i32_0 = arith.constant 0 : i32
    %c0_i32_1 = arith.constant 0 : i32
    return %c0_i32, %c0_i32_0 : i32, i32
  }
  func.func @transform_23(%arg0: i32) -> (i32, i32) {
    %c0_i32 = arith.constant 0 : i32
    %c0_i32_0 = arith.constant 0 : i32
    %c0_i32_1 = arith.constant 0 : i32
    return %c0_i32, %c0_i32_0 : i32, i32
  }
  func.func @transform_24(%arg0: i32) -> (i32, i32) {
    %c0_i32 = arith.constant 0 : i32
    %c0_i32_0 = arith.constant 0 : i32
    %c0_i32_1 = arith.constant 0 : i32
    return %c0_i32, %c0_i32_0 : i32, i32
  }
  func.func @transform_25(%arg0: i32) -> (i32, i32) {
    %c0_i32 = arith.constant 0 : i32
    %c0_i32_0 = arith.constant 0 : i32
    return %arg0, %c0_i32 : i32, i32
  }
  func.func @transform_26(%arg0: i32) -> (i32, i32) {
    %c0_i32 = arith.constant 0 : i32
    %c0_i32_0 = arith.constant 0 : i32
    return %arg0, %c0_i32 : i32, i32
  }
}

</mosaic_0001>

<bundles_post_ra>
// kernel: tpu_custom_call.1
= control target key start
LH: loop header
LB: loop body
LE: loop exit
PB: predicated region body
PF: predicated region fallthrough
CT: control target
= control target key end

     0   :  { %s4446_s0 = inlined_call_operand.vmem [shape: f32[64,2], index: 0, kind: input, shape index: {}]   ;;  %s4447_s1 = inlined_call_operand.vmem [shape: bf16[2,128], index: 1, kind: input, shape index: {}]   ;;  %s4448_s2 = inlined_call_operand.vmem [shape: bf16[128,128], index: 2, kind: input, shape index: {}]   ;;  %s4449_s3 = inlined_call_operand.hbm [shape: bf16[128,128], index: 3, kind: input, shape index: {}]   ;;  %s4450_s4 = inlined_call_operand.hbm [shape: bf16[128,128], index: 4, kind: input, shape index: {}]   ;;  %s4451_s5 = inlined_call_operand.hbm [shape: bf16[128,128], index: 5, kind: input, shape index: {}]   ;;  %s4452_s6 = inlined_call_operand.hbm [shape: bf16[128,128], index: 6, kind: input, shape index: {}]   ;;  %s4453_s7 = inlined_call_operand.hbm [shape: bf16[128,128], index: 7, kind: input, shape index: {}]   ;;  %s4454_s8 = inlined_call_operand.hbm [shape: bf16[128,128], index: 8, kind: input, shape index: {}]   ;;  %s4455_s9 = inlined_call_operand.hbm [shape: bf16[128,128], index: 9, kind: input, shape index: {}]   ;;  %s4456_s10 = inlined_call_operand.hbm [shape: bf16[128,128], index: 10, kind: input, shape index: {}]   ;;  %s4457_s11 = inlined_call_operand.hbm [shape: bf16[128,128], index: 11, kind: input, shape index: {}]   ;;  %s4458_s12 = inlined_call_operand.hbm [shape: bf16[128,128], index: 12, kind: input, shape index: {}]   ;;  %s4459_s13 = inlined_call_operand.vmem [shape: f32[1,128], index: 13, kind: input, shape index: {}]   ;;  %s4460_s14 = inlined_call_operand.vmem [shape: f32[1,128], index: 14, kind: input, shape index: {}]   ;;  %s4461_s15 = inlined_call_operand.vmem [shape: f32[1,128], index: 15, kind: input, shape index: {}]   ;;  %s4462_s16 = inlined_call_operand.vmem [shape: f32[1,128], index: 16, kind: input, shape index: {}]   ;;  %s4463_s17 = inlined_call_operand.vmem [shape: f32[1,128], index: 17, kind: input, shape index: {}]   ;;  %s4464_s18 = inlined_call_operand.vmem [shape: f32[1,128], index: 18, kind: input, shape index: {}]   ;;  %s4465_s19 = inlined_call_operand.vmem [shape: f32[1,128], index: 19, kind: input, shape index: {}]   ;;  %s4466_s20 = inlined_call_operand.vmem [shape: f32[1,128], index: 20, kind: input, shape index: {}]   ;;  %s4467_s21 = inlined_call_operand.vmem [shape: f32[1,128], index: 21, kind: input, shape index: {}]   ;;  %s4468_s22 = inlined_call_operand.vmem [shape: f32[1,128], index: 22, kind: input, shape index: {}]   ;;  %s4469_s23 = inlined_call_operand.vmem [shape: f32[1,128], index: 23, kind: input, shape index: {}]   ;;  %s4470_s24 = inlined_call_operand.vmem [shape: f32[1,128], index: 24, kind: input, shape index: {}]   ;;  %s4471_s25 = inlined_call_operand.vmem [shape: f32[64,8], index: 25, kind: output, shape index: {0}]   ;;  %s4472_s26 = inlined_call_operand.hbm [shape: s8[64,512], index: 26, kind: output, shape index: {1}]  }
   0x1   :  { %4483 = sst [smem:[#allocation33_spill]] %s4446_s0 }
   0x2   :  { %4484 = sst [smem:[#allocation34_spill]] %s4447_s1 }
   0x3   :  { %4485 = sst [smem:[#allocation35_spill]] %s4448_s2 }
   0x4   :  { %4486 = sst [smem:[#allocation36_spill]] %s4449_s3 }
   0x5   :  { %4487 = sst [smem:[#allocation37_spill]] %s4450_s4 }
   0x6   :  { %4488 = sst [smem:[#allocation38_spill]] %s4451_s5 }
   0x7   :  { %4489 = sst [smem:[#allocation39_spill]] %s4452_s6 }
   0x8   :  { %4490 = sst [smem:[#allocation40_spill]] %s4453_s7 }
   0x9   :  { %4491 = sst [smem:[#allocation41_spill]] %s4454_s8 }
   0xa   :  { %4492 = sst [smem:[#allocation42_spill]] %s4455_s9 }
   0xb   :  { %4493 = sst [smem:[#allocation43_spill]] %s4456_s10 }
   0xc   :  { %4494 = sst [smem:[#allocation44_spill]] %s4470_s24 }
   0xd   :  { %4495 = sst [smem:[#allocation45_spill]] %s4471_s25 }
   0xe   :  { %4496 = sst [smem:[#allocation46_spill]] %s4472_s26 }
   0xf   :  { %32 = vsyncpa [#allocation3], 0 }
  0x10   :  { %33 = vsyncpa [#allocation6], 0 }
  0x11   :  { %34 = vsyncpa [#allocation9], 0 }
  0x12   :  { %35 = vsyncpa [#allocation12], 0 }
  0x13   :  { %36 = vsyncpa [#allocation15], 0 }
  0x14   :  { %37 = vsyncpa [#allocation18], 0 }
  0x15   :  { %38 = vsyncpa [#allocation4], 0 }
  0x16   :  { %40 = vsyncpa [#allocation4 + $0x1], 0  ;;  %s4041_s27 = smov 0   ;;  %s4043_s3 = smov 0  }
  0x17   :  { %s4045_s7 = smov 0   ;;  %s4047_s28 = smov 0  }
  0x18 LB: > { %4497 = sst [smem:[#allocation27_spill]] %s3871_s27  ;;  %s4062_s8 = sadd.s32 4294967295, %s3883_s28   ;;  %s3883_s28 = sphi %s4047_s28, %s4538_s28   ;;  %s3879_s7 = sphi %s4045_s7, %s4540_s7   ;;  %s3875_s3 = sphi %s4043_s3, %s4542_s3   ;;  %s3871_s27 = sphi %s4041_s27, %s4541_s27  }
  0x19   : > { %4498 = sst [smem:[#allocation28_spill]] %s3879_s7  ;;  %s2821_s4 = sadd.s32 4294967294, %s3883_s28  }
  0x1a   : > { %4499 = sst [smem:[#allocation29_spill]] %s3883_s28  ;;  %s4066_s29 = sadd.s32 1, %s3883_s28  }
  0x1b   : > { %4500 = sst [smem:[#allocation30_spill]] %s4066_s29  ;;  %s609_s0 = sadd.s32 1, %s3879_s7 }
  0x1c   : > { %s606_s9 = ssub.s32 %s3883_s28, %s4066_s29  ;;  %p619_p0 = scmp.ne.s32.totalorder %s3879_s7, %s3875_s3 }
  0x1d   : > { %p607_p1 = scmp.eq.s32.totalorder %s606_s9, 0  ;;  %p620_p2 = scmp.eq.s32.totalorder %s4062_s8, 1 }
  0x1e   : > { %p625_p3 = scmp.ne.s32.totalorder %s3875_s3, %s3871_s27  ;;  %p626_p4 = scmp.eq.s32.totalorder %s2821_s4, 1 }
  0x1f   : > { %s4077_s30 = scalar_select %p607_p1, %s3879_s7, %s609_s0  }
  0x20   : > { %p4079_p5 = por %p620_p2, %p619_p0  ;;  %p4083_p6 = por %p626_p4, %p625_p3 }
  0x21   : > { %4501 = sst [smem:[#allocation31_spill]] %s4077_s30  ;;  %p2822_p7 = scmp.ge.s32.totalorder %s3883_s28, 1 }
  0x22   : > { %s4503_s5 = scalar_select %p4083_p6, 1, 0 }
  0x23   : > { %p633_p8 = scmp.lt.s32.totalorder %s3883_s28, 3  ;;  %p4481_p9 = scmp.eq.s32.totalorder %s4062_s8, 0 }
  0x24   : > { %4504 = sst [smem:[#allocation32_spill]] %s4503_s5  ;;  %s3885_s6 = smov [#allocation5]  }
  0x25   : > { %p4090_p10 = pnand %p2822_p7, %p633_p8  ;;  %s664_s1 = sshll.u32 %s3885_s6, 4  ;;  %s665_s1 = int_to_ptr.vmem [resolvable:$true] %s664_s1 }
  0x26   : > { %s3886_s0 = smov [#allocation8]   ;;  %s3887_s30 = smov [#allocation11]  }
  0x27   : > { %p3341_p11 = pneg %p4090_p10  ;;  %s690_s9 = sshll.u32 %s3886_s0, 4  ;;  %s691_s9 = int_to_ptr.vmem [resolvable:$true] %s690_s9 }
  0x28   : > { %s716_s7 = sshll.u32 %s3887_s30, 4  ;;  %s3550_s5 = scalar_lea.vmem %s665_s1, 1024  ;;  %s717_s7 = int_to_ptr.vmem [resolvable:$true] %s716_s7 }
  0x29   : > { %p4098_p12 = pnand %p4481_p9, %p3341_p11  ;;  %p3551_p0 = scmp.ne.s32.totalorder %s665_s1, %s3550_s5 }
  0x2a   : > { %p3558_p3 = scmp.lt.s32.totalorder %s665_s1, %s665_s1  ;;  %p3559_p4 = scmp.lt.s32.totalorder %s3550_s5, %s3550_s5 }
  0x2b   : > { %p4104_p13 = pneg %p4098_p12 }
  0x2c   : > { %p3560_p7 = por %p3559_p4, %p3558_p3 }
  0x2d   : > { %p3553_p1 = pnand %p3551_p0, %p4104_p13 }
  0x2f   : > { %p3554_p2 = pneg %p3553_p1 }
  0x31   : > { %p3561_p8 = pnand %p3560_p7, %p3554_p2 }
  0x33   : > { %3564 = shalt.err (!%p3561_p8)
}
  0x34   : > { %s3888_s6 = smov 64   ;;  %s3889_s30 = smov 4  }
  0x35   : > { %s4508_s28 = sld [smem:[#allocation37_spill]]  ;;  %s3576_s25 = scalar_lea.vmem %s691_s9, 1024 }
  0x36   : > { %p3577_p11 = scmp.ne.s32.totalorder %s691_s9, %s3576_s25  ;;  %p3584_p3 = scmp.lt.s32.totalorder %s691_s9, %s691_s9 }
  0x37   : > { %p3585_p2 = scmp.lt.s32.totalorder %s3576_s25, %s3576_s25 }
  0x38   : > { %p3579_p0 = pnand %p3577_p11, %p4104_p13 }
  0x39   : > { %p3586_p4 = por %p3585_p2, %p3584_p3 }
  0x3a   : > { %p3580_p1 = pneg %p3579_p0 }
  0x3b   : > { %3347 = dma.hbm_to_vmem [thread:$0]  (!%p4098_p12), %s4508_s28, 1024, %s665_s1, [#allocation6], %s3888_s6, %s3888_s6, %s3889_s30  }
  0x3c   : > { %p3587_p7 = pnand %p3586_p4, %p3580_p1 }
  0x3e   : > { %3590 = shalt.err (!%p3587_p7)
}
  0x3f   : > { %s4509_s26 = sld [smem:[#allocation39_spill]]  ;;  %s3602_s27 = scalar_lea.vmem %s717_s7, 1024 }
  0x40   : > { %p3603_p8 = scmp.ne.s32.totalorder %s717_s7, %s3602_s27  ;;  %p3610_p9 = scmp.lt.s32.totalorder %s717_s7, %s717_s7 }
  0x41   : > { %p3611_p3 = scmp.lt.s32.totalorder %s3602_s27, %s3602_s27 }
  0x42   : > { %p3605_p11 = pnand %p3603_p8, %p4104_p13 }
  0x43   : > { %p3612_p1 = por %p3611_p3, %p3610_p9 }
  0x44   : > { %p3606_p0 = pneg %p3605_p11 }
  0x45   : > { %3353 = dma.hbm_to_vmem [thread:$0]  (!%p4098_p12), %s4509_s26, 1024, %s691_s9, [#allocation9], %s3888_s6, %s3888_s6, %s3889_s30  }
  0x46   : > { %p3613_p2 = pnand %p3612_p1, %p3606_p0 }
  0x48   : > { %3616 = shalt.err (!%p3613_p2)
}
  0x49   : > { %s4510_s28 = sld [smem:[#allocation41_spill]]  ;;  %s3890_s26 = smov [#allocation14]  }
  0x4a   : > { %s742_s1 = sshll.u32 %s3890_s26, 4  ;;  %s3891_s9 = smov [#allocation2]   ;;  %s743_s1 = int_to_ptr.vmem [resolvable:$true] %s742_s1 }
  0x4b   : > { %s651_s0 = sshll.u32 %s3891_s9, 4  ;;  %s3628_s5 = scalar_lea.vmem %s743_s1, 1024  ;;  %s652_s0 = int_to_ptr.vmem [resolvable:$true] %s651_s0 }
  0x4c   : > { %p3629_p4 = scmp.ne.s32.totalorder %s743_s1, %s3628_s5  ;;  %p3636_p8 = scmp.lt.s32.totalorder %s743_s1, %s743_s1 }
  0x4d   : > { %p3637_p11 = scmp.lt.s32.totalorder %s3628_s5, %s3628_s5 }
  0x4e   : > { %p3631_p9 = pnand %p3629_p4, %p4104_p13 }
  0x4f   : > { %3359 = dma.hbm_to_vmem [thread:$0]  (!%p4098_p12), %s4510_s28, 1024, %s717_s7, [#allocation12], %s3888_s6, %s3888_s6, %s3889_s30  }
  0x50   : > { %p3632_p7 = pneg %p3631_p9  ;;  %p3638_p0 = por %p3637_p11, %p3636_p8 }
  0x52   : > { %p3639_p3 = pnand %p3638_p0, %p3632_p7 }
  0x54   : > { %3642 = shalt.err (!%p3639_p3)
}
  0x55   : > { %s4511_s25 = sld [smem:[#allocation43_spill]]  ;;  %s3654_s24 = scalar_lea.vmem %s652_s0, 1024 }
  0x56   : > { %p3655_p1 = scmp.ne.s32.totalorder %s652_s0, %s3654_s24  ;;  %p3662_p9 = scmp.lt.s32.totalorder %s652_s0, %s652_s0 }
  0x57   : > { %p3663_p8 = scmp.lt.s32.totalorder %s3654_s24, %s3654_s24 }
  0x58   : > { %p3657_p2 = pnand %p3655_p1, %p4104_p13 }
  0x59   : > { %p3664_p7 = por %p3663_p8, %p3662_p9 }
  0x5a   : > { %p3658_p4 = pneg %p3657_p2 }
  0x5b   : > { %3365 = dma.hbm_to_vmem [thread:$0]  (!%p4098_p12), %s4511_s25, 1024, %s743_s1, [#allocation15], %s3888_s6, %s3888_s6, %s3889_s30  }
  0x5c   : > { %p3665_p11 = pnand %p3664_p7, %p3658_p4 }
  0x5e   : > { %3668 = shalt.err (!%p3665_p11)
}
  0x5f   : > { %s4512_s9 = sld [smem:[#allocation36_spill]]  ;;  %s3892_s1 = smov [#allocation7]  }
  0x60   : > { %s677_s5 = sshll.u32 %s3892_s1, 4  ;;  %s3893_s7 = smov [#allocation10]   ;;  %s678_s5 = int_to_ptr.vmem [resolvable:$true] %s677_s5 }
  0x61   : > { %s703_s27 = sshll.u32 %s3893_s7, 4  ;;  %s3680_s25 = scalar_lea.vmem %s678_s5, 1024  ;;  %s704_s27 = int_to_ptr.vmem [resolvable:$true] %s703_s27 }
  0x62   : > { %p3681_p0 = scmp.ne.s32.totalorder %s678_s5, %s3680_s25  ;;  %p3688_p2 = scmp.lt.s32.totalorder %s678_s5, %s678_s5 }
  0x63   : > { %p3689_p4 = scmp.lt.s32.totalorder %s3680_s25, %s3680_s25 }
  0x64   : > { %p3683_p3 = pnand %p3681_p0, %p4104_p13 }
  0x65   : > { %3344 = dma.hbm_to_vmem [thread:$0]  (!%p4098_p12), %s4512_s9, 1024, %s652_s0, [#allocation3], %s3888_s6, %s3888_s6, %s3889_s30  }
  0x66   : > { %p3684_p1 = pneg %p3683_p3  ;;  %p3690_p9 = por %p3689_p4, %p3688_p2 }
  0x68   : > { %p3691_p8 = pnand %p3690_p9, %p3684_p1 }
  0x6a   : > { %3694 = shalt.err (!%p3691_p8)
}
  0x6b   : > { %s4513_s28 = sld [smem:[#allocation38_spill]]  ;;  %s3706_s26 = scalar_lea.vmem %s704_s27, 1024 }
  0x6c   : > { %p3707_p7 = scmp.ne.s32.totalorder %s704_s27, %s3706_s26  ;;  %p3714_p3 = scmp.lt.s32.totalorder %s704_s27, %s704_s27 }
  0x6d   : > { %p3715_p2 = scmp.lt.s32.totalorder %s3706_s26, %s3706_s26 }
  0x6e   : > { %p3709_p11 = pnand %p3707_p7, %p4104_p13 }
  0x6f   : > { %p3716_p1 = por %p3715_p2, %p3714_p3 }
  0x70   : > { %p3710_p0 = pneg %p3709_p11 }
  0x71   : > { %3350 = dma.hbm_to_vmem [thread:$0]  (!%p4098_p12), %s4513_s28, 1024, %s678_s5, [#allocation6], %s3888_s6, %s3888_s6, %s3889_s30  }
  0x72   : > { %p3717_p4 = pnand %p3716_p1, %p3710_p0 }
  0x74   : > { %3720 = shalt.err (!%p3717_p4)
}
  0x75   : > { %s4514_s7 = sld [smem:[#allocation40_spill]]  ;;  %s3894_s5 = smov [#allocation13]  }
  0x76   : > { %s729_s25 = sshll.u32 %s3894_s5, 4  ;;  %s3895_s0 = smov [#allocation16]   ;;  %s730_s25 = int_to_ptr.vmem [resolvable:$true] %s729_s25 }
  0x77   : > { %s755_s24 = sshll.u32 %s3895_s0, 4  ;;  %s3732_s28 = scalar_lea.vmem %s730_s25, 1024  ;;  %s756_s24 = int_to_ptr.vmem [resolvable:$true] %s755_s24 }
  0x78   : > { %p3733_p9 = scmp.ne.s32.totalorder %s730_s25, %s3732_s28  ;;  %p3740_p11 = scmp.lt.s32.totalorder %s730_s25, %s730_s25 }
  0x79   : > { %p3741_p0 = scmp.lt.s32.totalorder %s3732_s28, %s3732_s28 }
  0x7a   : > { %p3735_p8 = pnand %p3733_p9, %p4104_p13 }
  0x7b   : > { %3356 = dma.hbm_to_vmem [thread:$0]  (!%p4098_p12), %s4514_s7, 1024, %s704_s27, [#allocation9], %s3888_s6, %s3888_s6, %s3889_s30  }
  0x7c   : > { %p3736_p7 = pneg %p3735_p8  ;;  %p3742_p3 = por %p3741_p0, %p3740_p11 }
  0x7e   : > { %p3743_p2 = pnand %p3742_p3, %p3736_p7 }
  0x80   : > { %3746 = shalt.err (!%p3743_p2)
}
  0x81   : > { %s4515_s9 = sld [smem:[#allocation42_spill]]  ;;  %s3758_s1 = scalar_lea.vmem %s756_s24, 1024 }
  0x82   : > { %p3759_p1 = scmp.ne.s32.totalorder %s756_s24, %s3758_s1  ;;  %p3766_p8 = scmp.lt.s32.totalorder %s756_s24, %s756_s24 }
  0x83   : > { %p3767_p11 = scmp.lt.s32.totalorder %s3758_s1, %s3758_s1 }
  0x84   : > { %p3761_p4 = pnand %p3759_p1, %p4104_p13 }
  0x85   : > { %p3768_p7 = por %p3767_p11, %p3766_p8 }
  0x86   : > { %p3762_p9 = pneg %p3761_p4 }
  0x87   : > { %3362 = dma.hbm_to_vmem [thread:$0]  (!%p4098_p12), %s4515_s9, 1024, %s730_s25, [#allocation12], %s3888_s6, %s3888_s6, %s3889_s30  }
  0x88   : > { %p3769_p0 = pnand %p3768_p7, %p3762_p9 }
  0x8a   : > { %3772 = shalt.err (!%p3769_p0)
}
  0x8b   : > { %3368 = dma.hbm_to_vmem [thread:$0]  (!%p4098_p12), %s4457_s11, 1024, %s756_s24, [#allocation15], %s3888_s6, %s3888_s6, %s3889_s30  }
  0x8c   : > { %s3896_s25 = smov [#allocation17]  }
  0x8d   : > { %s768_s0 = sshll.u32 %s3896_s25, 4  ;;  %s769_s0 = int_to_ptr.vmem [resolvable:$true] %s768_s0 }
  0x8e   : > { %s3784_s28 = scalar_lea.vmem %s769_s0, 1024  ;;  %p3792_p4 = scmp.lt.s32.totalorder %s769_s0, %s769_s0 }
  0x8f   : > { %p3785_p3 = scmp.ne.s32.totalorder %s769_s0, %s3784_s28  ;;  %p3793_p9 = scmp.lt.s32.totalorder %s3784_s28, %s3784_s28 }
  0x91   : > { %p3787_p2 = pnand %p3785_p3, %p4104_p13  ;;  %p3794_p8 = por %p3793_p9, %p3792_p4 }
  0x93   : > { %p3788_p1 = pneg %p3787_p2 }
  0x95   : > { %p3795_p11 = pnand %p3794_p8, %p3788_p1 }
  0x97   : > { %3798 = shalt.err (!%p3795_p11)
}
  0x98   : > { %3371 = dma.hbm_to_vmem [thread:$0]  (!%p4098_p12), %s4458_s12, 1024, %s769_s0, [#allocation18], %s3888_s6, %s3888_s6, %s3889_s30  }
  0x99   : > { %829 = sbr.rel (%p4090_p10) target bundleno = 2655 (0xa5f), region = 120  ;;  %p4516_p13 = scmp.eq.s32.totalorder (!%p4090_p10), %s4062_s8, 0 }
  0x9e   : > { %3842 = dma.done.wait (%p4516_p13), [#allocation3], 1024   ;;  %p4517_p7 = pmov %p4516_p13 }
  0xa0   : > { %3844 = vsyncadd (%p4517_p7), [#allocation3], 4294966272  ;;  %p4518_p0 = pmov %p4517_p7 }
  0xa2   : > { %3846 = dma.done.wait (%p4518_p0), [#allocation6], 2048   ;;  %p4519_p3 = pmov %p4518_p0 }
  0xa3   : > { %p4520_p2 = pmov %p4518_p0 }
  0xa4   : > { %3848 = vsyncadd (%p4519_p3), [#allocation6], 4294965248 }
  0xa5   : > { %3850 = dma.done.wait (%p4520_p2), [#allocation9], 2048   ;;  %p4521_p12 = pmov %p4518_p0 }
  0xa6   : > { %p4522_p10 = pmov %p4518_p0 }
  0xa7   : > { %3852 = vsyncadd (%p4521_p12), [#allocation9], 4294965248 }
  0xa8   : > { %3854 = dma.done.wait (%p4522_p10), [#allocation12], 2048   ;;  %p4523_p1 = pmov %p4518_p0 }
  0xa9   : > { %p4524_p4 = pmov %p4518_p0 }
  0xaa   : > { %3856 = vsyncadd (%p4523_p1), [#allocation12], 4294965248 }
  0xab   : > { %3858 = dma.done.wait (%p4524_p4), [#allocation15], 2048   ;;  %p4525_p9 = pmov %p4518_p0 }
  0xac   : > { %p4526_p8 = pmov %p4518_p0 }
  0xad   : > { %3860 = vsyncadd (%p4525_p9), [#allocation15], 4294965248 }
  0xae   : > { %3862 = dma.done.wait (%p4526_p8), [#allocation18], 1024   ;;  %p4527_p11 = pmov %p4518_p0 }
  0xaf   : > { %s2846_s29 = sshll.u32 %s4062_s8, 2  ;;  %vm976_vm0 = vcmask 1040384   ;;  %s4528_s30 = sld [smem:[#allocation33_spill]]  ;;  %vm969_vm1 = vcmask 15360   ;;  %v3897_v16 = vmov 0   ;;  %v3459_v17 = vld [vmem:[#allocation2 + $0x38] sm:$0xff]  }
  0xb0   : > { %3864 = vsyncadd (%p4527_p11), [#allocation18], 4294966272  ;;  %p941_p13 = scmp.lt.s32.totalorder %s2846_s29, 7  ;;  %s4529_s7 = sld [smem:[#allocation34_spill]]  ;;  %3449 = vset.pattern.permute.xlu1 %v3897_v16  ;;  %3450 = vset.pattern.permute.xlu0 %v3897_v16  ;;  %v3460_v18 = vld [vmem:[#allocation2 + $0x30] sm:$0xff]   ;;  %v3461_v19 = vld [vmem:[#allocation2 + $0x28] sm:$0xff]  }
  0xb1   : > { %s4530_s0 = sld [smem:[#allocation35_spill]]  ;;  %v3462_v20 = vld [vmem:[#allocation2 + $0x20] sm:$0xff]   ;;  %v3463_v21 = vld [vmem:[#allocation2 + $0x18] sm:$0xff]   ;;  %s937_s6 = sand.u32 1, %s3875_s3   ;;  %v3464_v38 = vld [vmem:[#allocation2 + $0x10] sm:$0xff]   ;;  %vm2293_vm9 = vcmask 130048  }
  0xb2   : > { %s4544_s29 = smov (!%p941_p13, %s2846_s29), 7  ;;  %v2850_v23 = vld [vmem:[%s4459_s13] ss:$0 sm:$0xff]  ;;  %v3465_v39 = vld [vmem:[#allocation2 + $0x8] sm:$0xff]   ;;  %v3467_v41 = vld [vmem:[#allocation5 + $0x38] sm:$0xff]   ;;  %s3898_s25 = smov 64  }
  0xb3   : > { %s4482_s10 = sshll.u32 %s4544_s29, 3  ;;  %v3466_v40 = vld [vmem:[#allocation2] sm:$0xff]   ;;  %v3468_v42 = vld [vmem:[#allocation5 + $0x30] sm:$0xff]   ;;  %v3469_v43 = vld [vmem:[#allocation5 + $0x28] sm:$0xff]   ;;  %s3899_s24 = smov 96   ;;  %vm1854_vm10 = vcmask 523264  }
  0xb4   : > { %v3470_v44 = vld [vmem:[#allocation5 + $0x20] sm:$0xff]   ;;  %v3471_v45 = vld [vmem:[#allocation5 + $0x18] sm:$0xff]   ;;  %v3472_v61 = vld [vmem:[#allocation5 + $0x10] sm:$0xff]   ;;  %s3900_s9 = smov 112   ;;  %s3901_s28 = smov 120   ;;  %vm2298_vm11 = vcmask 392192  }
  0xb5   : > { %s944_s26 = scalar_lea.vmem %s4528_s30, %s4482_s10  ;;  %s2845_s30 = sshll.u32 %s937_s6, 5  ;;  %v2853_v48 = vld [vmem:[%s4460_s14] ss:$0 sm:$0xff]  ;;  %v3473_v62 = vld [vmem:[#allocation5 + $0x8] sm:$0xff]   ;;  %vm1859_vm12 = vcmask 785408   ;;  %vm1864_vm13 = vcmask 916480  }
  0xb6   : > { %v961_v0 = vld [vmem:[%s4529_s7] sm:$0x1]  ;;  %v956_v2 = vld [vmem:[%s944_s26 + $0x8] sm:$0xff]  ;;  %v957_v5 = vld [vmem:[%s944_s26 + $0x10] sm:$0xff]  ;;  %s3903_s5 = smov 48   ;;  %vm1869_vm14 = vcmask 982016  }
  0xb7   : > { %v955_v1 = vld [vmem:[%s944_s26] sm:$0xff]  ;;  %3298 = vmatprep.subr.msk.bf16.mxu0 %vm976_vm0, %v961_v0  ;;  %v978_v3 = vsel %vm976_vm0, %v961_v0, 0  ;;  %v958_v6 = vld [vmem:[%s944_s26 + $0x18] sm:$0xff]  ;;  %v3452_v9 = vld [vmem:[%s4530_s0 + $0x30] sm:$0xff]   ;;  %s4279_s26 = scalar_lea.vmem [#allocation19], %s2845_s30  ;;  %s2958_s27 = sshll.u32 %s4062_s8, 9 }
  0xb8   : > { %v959_v4 = vpack.c.bf16 %v956_v2, %v955_v1  ;;  %3073 = vmatpush3.bf16.msra.mxu0 %v978_v3  ;;  %v960_v7 = vpack.c.bf16 %v958_v6, %v957_v5  ;;  %v3451_v8 = vld [vmem:[%s4530_s0 + $0x38] sm:$0xff]   ;;  %v3453_v10 = vld [vmem:[%s4530_s0 + $0x28] sm:$0xff]   ;;  %v3454_v11 = vld [vmem:[%s4530_s0 + $0x20] sm:$0xff]   ;;  %s2621_s7 = scalar_lea.sflag [#allocation4], %s937_s6 }
  0xb9   : > { %3078 = vmatprep.subr.bf16.mxu1 %v3451_v8  ;;  %v3455_v12 = vld [vmem:[%s4530_s0 + $0x18] sm:$0xff]   ;;  %v3456_v13 = vld [vmem:[%s4530_s0 + $0x10] sm:$0xff]   ;;  %v3457_v14 = vld [vmem:[%s4530_s0 + $0x8] sm:$0xff]   ;;  %3098 = vmatprep.subr.bf16.mxu0 %v3459_v17 }
  0xba   : > { %3074 = vmatprep.mubr.msk.bf16.mxu0 %vm969_vm1, %v959_v4  ;;  %3079 = vmatpush3.bf16.msra.mxu1 %v3451_v8  ;;  %v3458_v15 = vld [vmem:[%s4530_s0] sm:$0xff]   ;;  %v3475_v1 = vld [vmem:[#allocation7 + $0x38] sm:$0xff]   ;;  %v3476_v2 = vld [vmem:[#allocation7 + $0x30] sm:$0xff]  }
  0xbb   : > { %3075 = vmatmul.mubr.msk.bf16.vlgmr.msra.gmra.mxu0 %vm969_vm1, %v960_v7  ;;  %3080 = vmatprep.subr.bf16.mxu1 %v3452_v9  ;;  %v3474_v63 = vld [vmem:[#allocation5] sm:$0xff]   ;;  %v3477_v6 = vld [vmem:[#allocation7 + $0x28] sm:$0xff]  }
  0xbc   : > { %3099 = vmatpush3.bf16.msra.mxu0 %v3459_v17  ;;  %v2862_v0 = vld [vmem:[%s4461_s15] ss:$0 sm:$0xff] }
  0xbd   : > { %3100 = vmatprep.subr.bf16.mxu0 %v3460_v18 }
  0xbe   : > { %3081 = vmatpush3.bf16.msra.mxu1 %v3452_v9 }
  0xbf   : > { %3082 = vmatprep.subr.bf16.mxu1 %v3453_v10 }
  0xc0   : > { %3101 = vmatpush3.bf16.msra.mxu0 %v3460_v18  ;;  %v3479_v18 = vld [vmem:[#allocation7 + $0x18] sm:$0xff]  }
  0xc1   : > { %3102 = vmatprep.subr.bf16.mxu0 %v3461_v19 }
  0xc2   : > { %3083 = vmatpush3.bf16.msra.mxu1 %v3453_v10 }
  0xc3   : > { %3084 = vmatprep.subr.bf16.mxu1 %v3454_v11 }
  0xc4   : > { %3103 = vmatpush3.bf16.msra.mxu0 %v3461_v19 }
  0xc5   : > { %3104 = vmatprep.subr.bf16.mxu0 %v3462_v20 }
  0xc6   : > { %3085 = vmatpush3.bf16.msra.mxu1 %v3454_v11  ;;  %v3478_v11 = vld [vmem:[#allocation7 + $0x20] sm:$0xff]  }
  0xc7   : > { %3086 = vmatprep.subr.bf16.mxu1 %v3455_v12 }
  0xc8   : > { %3105 = vmatpush3.bf16.msra.mxu0 %v3462_v20 }
  0xc9   : > { %3106 = vmatprep.subr.bf16.mxu0 %v3463_v21 }
  0xca   : > { %3087 = vmatpush3.bf16.msra.mxu1 %v3455_v12 }
  0xcb   : > { %3088 = vmatprep.subr.bf16.mxu1 %v3456_v13 }
  0xcc   : > { %3107 = vmatpush3.bf16.msra.mxu0 %v3463_v21  ;;  %v3480_v21 = vld [vmem:[#allocation7 + $0x10] sm:$0xff]  }
  0xcd   : > { %3108 = vmatprep.subr.bf16.mxu0 %v3464_v38 }
  0xce   : > { %3089 = vmatpush3.bf16.msra.mxu1 %v3456_v13 }
  0xcf   : > { %3090 = vmatprep.subr.bf16.mxu1 %v3457_v14 }
  0xd0   : > { %3109 = vmatpush3.bf16.msra.mxu0 %v3464_v38 }
  0xd1   : > { %3110 = vmatprep.subr.bf16.mxu0 %v3465_v39 }
  0xd2   : > { %3091 = vmatpush3.bf16.msra.mxu1 %v3457_v14 }
  0xd3   : > { %3092 = vmatprep.subr.bf16.mxu1 %v3458_v15 }
  0xd4   : > { %3111 = vmatpush3.bf16.msra.mxu0 %v3465_v39 }
  0xd5   : > { %3112 = vmatprep.subr.bf16.mxu0 %v3466_v40 }
  0xd6   : > { %3093 = vmatpush3.bf16.msra.mxu1 %v3458_v15 }
  0xd7   : > { %3118 = vmatprep.subr.bf16.mxu1 %v3467_v41 }
  0xd8   : > { %3113 = vmatpush3.bf16.msra.mxu0 %v3466_v40 }
  0xd9   : > { %3138 = vmatprep.subr.bf16.mxu0 %v3475_v1 }
 0x17b   : > { %v3076_v22 = vpop.f32.mrf.mxu0 }
 0x17c   : > { %v1023_v25 = vadd.f32 %v3076_v22, %v2850_v23  ;;  %v3481_v22 = vld [vmem:[#allocation7 + $0x8] sm:$0xff]  }
 0x17d   : > { %v1014_v24 = vpop.f32.mrf.mxu0 }
 0x17e   : > { %v1015_v27 = vadd.f32 %v2850_v23, %v1014_v24  ;;  %vm1031_vm3 = vcmp.ge.f32.partialorder %v1023_v25, 0.0  ;;  %v1040_v34 = vmax.f32 %v1023_v25, 0.0  ;;  %v2871_v24 = vld [vmem:[%s4462_s16] ss:$0 sm:$0xff]  ;;  %v3483_v25 = vld [vmem:[#allocation8 + $0x38] sm:$0xff]  }
 0x17f   : > { %v3077_v26 = vpop.f32.mrf.mxu0 }
 0x180   : > { %v1026_v28 = vadd.f32 %v3077_v26, %v2850_v23  ;;  %vm1029_vm4 = vcmp.ge.f32.partialorder %v1015_v27, 0.0  ;;  %v1038_v32 = vmax.f32 %v1015_v27, 0.0  ;;  %v3484_v26 = vld [vmem:[#allocation8 + $0x30] sm:$0xff]  }
 0x181   : > { %v1017_v29 = vpop.f32.mrf.mxu0 }
 0x182   : > { %vm1032_vm2 = vcmp.ge.f32.partialorder %v1026_v28, 0.0  ;;  %v1018_v30 = vadd.f32 %v2850_v23, %v1017_v29  ;;  %v1041_v31 = vmax.f32 %v1026_v28, 0.0  ;;  %v3482_v23 = vld [vmem:[#allocation7] sm:$0xff]  }
 0x183   : > { %vm1034_vm5 = vmpackc.low %vm1032_vm2, %vm1031_vm3 }
 0x184   : > { %vm1030_vm6 = vcmp.ge.f32.partialorder %v1018_v30, 0.0  ;;  %v1039_v33 = vmax.f32 %v1018_v30, 0.0  ;;  %v1043_v37 = vpack.c.bf16 %v1041_v31, %v1040_v34  ;;  %v3485_v30 = vld [vmem:[#allocation8 + $0x28] sm:$0xff]  }
 0x185   : > { %vm1033_vm7 = vmpackc.low %vm1030_vm6, %vm1029_vm4 }
 0x186   : > { %vm1035_vm8 = vmpackc.even %vm1034_vm5, %vm1033_vm7  ;;  %v1042_v35 = vpack.c.bf16 %v1039_v33, %v1038_v32 }
 0x187   : > { %v1036_v36 = vsel %vm1035_vm8, 16843009, %v3897_v16 }
 0x188   : > { %1037 = vst [vmem:[%s4279_s26] sm:$0xff] %v1036_v36  ;;  %3094 = vmatprep.mubr.bf16.mxu1 %v1042_v35  ;;  %v3486_v35 = vld [vmem:[#allocation8 + $0x20] sm:$0xff]  }
 0x189   : > { %3095 = vmatmul.mubr.bf16.vlgmr.msra.gmra.mxu1 %v1043_v37 }
 0x18a   : > { %3119 = vmatpush3.bf16.msra.mxu1 %v3467_v41  ;;  %v3487_v41 = vld [vmem:[#allocation8 + $0x18] sm:$0xff]  }
 0x18b   : > { %3120 = vmatprep.subr.bf16.mxu1 %v3468_v42 }
 0x18e   : > { %3121 = vmatpush3.bf16.msra.mxu1 %v3468_v42 }
 0x18f   : > { %3122 = vmatprep.subr.bf16.mxu1 %v3469_v43 }
 0x192   : > { %3123 = vmatpush3.bf16.msra.mxu1 %v3469_v43 }
 0x193   : > { %3124 = vmatprep.subr.bf16.mxu1 %v3470_v44 }
 0x196   : > { %3125 = vmatpush3.bf16.msra.mxu1 %v3470_v44  ;;  %v3488_v44 = vld [vmem:[#allocation8 + $0x10] sm:$0xff]  }
 0x197   : > { %3126 = vmatprep.subr.bf16.mxu1 %v3471_v45 }
 0x19a   : > { %3127 = vmatpush3.bf16.msra.mxu1 %v3471_v45  ;;  %v3489_v45 = vld [vmem:[#allocation8 + $0x8] sm:$0xff]  }
 0x19b   : > { %3128 = vmatprep.subr.bf16.mxu1 %v3472_v61 }
 0x19e   : > { %3129 = vmatpush3.bf16.msra.mxu1 %v3472_v61 }
 0x19f   : > { %3130 = vmatprep.subr.bf16.mxu1 %v3473_v62 }
 0x1a2   : > { %3131 = vmatpush3.bf16.msra.mxu1 %v3473_v62  ;;  %v3494_v62 = vld [vmem:[#allocation10 + $0x20] sm:$0xff]  }
 0x1a3   : > { %3132 = vmatprep.subr.bf16.mxu1 %v3474_v63 }
 0x1a6   : > { %3133 = vmatpush3.bf16.msra.mxu1 %v3474_v63 }
 0x1a7   : > { %3158 = vmatprep.subr.bf16.mxu1 %v3483_v25 }
 0x249   : > { %v3096_v46 = vpop.f32.mrf.mxu1 }
 0x24a   : > { %v4289_v52 = vadd.f32 %v3096_v46, %v2853_v48  ;;  %v3490_v46 = vld [vmem:[#allocation8] sm:$0xff]  }
 0x24b   : > { %v1149_v47 = vpop.f32.mrf.mxu1 }
 0x24c   : > { %v4285_v50 = vadd.f32 %v2853_v48, %v1149_v47  ;;  %v1166_v58 = vmax.f32 %v4289_v52, 0.0  ;;  %v2880_v47 = vld [vmem:[%s4463_s17] ss:$0 sm:$0xff] }
 0x24d   : > { %v3097_v49 = vpop.f32.mrf.mxu1 }
 0x24e   : > { %v4287_v51 = vadd.f32 %v3097_v49, %v2853_v48  ;;  %v1164_v56 = vmax.f32 %v4285_v50, 0.0  ;;  %v3492_v49 = vld [vmem:[#allocation10 + $0x30] sm:$0xff]  }
 0x24f   : > { %v1152_v53 = vpop.f32.mrf.mxu1 }
 0x250   : > { %v4291_v54 = vadd.f32 %v2853_v48, %v1152_v53  ;;  %v1167_v55 = vmax.f32 %v4287_v51, 0.0  ;;  %v3491_v48 = vld [vmem:[#allocation10 + $0x38] sm:$0xff]  }
 0x252   : > { %v1165_v57 = vmax.f32 %v4291_v54, 0.0  ;;  %v1169_v60 = vpack.c.bf16 %v1167_v55, %v1166_v58 }
 0x254   : > { %v1168_v59 = vpack.c.bf16 %v1165_v57, %v1164_v56  ;;  %v3493_v57 = vld [vmem:[#allocation10 + $0x28] sm:$0xff]  }
 0x256   : > { %3114 = vmatprep.mubr.bf16.mxu0 %v1168_v59 }
 0x257   : > { %3115 = vmatmul.mubr.bf16.vlgmr.msra.gmra.mxu0 %v1169_v60 }
 0x258   : > { %3139 = vmatpush3.bf16.msra.mxu0 %v3475_v1 }
 0x259   : > { %3140 = vmatprep.subr.bf16.mxu0 %v3476_v2 }
 0x25c   : > { %3141 = vmatpush3.bf16.msra.mxu0 %v3476_v2 }
 0x25d   : > { %3142 = vmatprep.subr.bf16.mxu0 %v3477_v6 }
 0x260   : > { %3143 = vmatpush3.bf16.msra.mxu0 %v3477_v6 }
 0x261   : > { %3144 = vmatprep.subr.bf16.mxu0 %v3478_v11 }
 0x264   : > { %3145 = vmatpush3.bf16.msra.mxu0 %v3478_v11 }
 0x265   : > { %3146 = vmatprep.subr.bf16.mxu0 %v3479_v18 }
 0x268   : > { %3147 = vmatpush3.bf16.msra.mxu0 %v3479_v18  ;;  %v3499_v18 = vld [vmem:[#allocation11 + $0x38] sm:$0xff]  }
 0x269   : > { %3148 = vmatprep.subr.bf16.mxu0 %v3480_v21 }
 0x26c   : > { %3149 = vmatpush3.bf16.msra.mxu0 %v3480_v21 }
 0x26d   : > { %3150 = vmatprep.subr.bf16.mxu0 %v3481_v22 }
 0x270   : > { %3151 = vmatpush3.bf16.msra.mxu0 %v3481_v22 }
 0x271   : > { %3152 = vmatprep.subr.bf16.mxu0 %v3482_v23 }
 0x274   : > { %3153 = vmatpush3.bf16.msra.mxu0 %v3482_v23  ;;  %v3501_v23 = vld [vmem:[#allocation11 + $0x28] sm:$0xff]  }
 0x275   : > { %3178 = vmatprep.subr.bf16.mxu0 %v3491_v48 }
 0x317   : > { %v3116_v3 = vpop.f32.mrf.mxu0 }
 0x318   : > { %v1284_v4 = vadd.f32 %v3116_v3, %v2862_v0 }
 0x319   : > { %v1275_v5 = vpop.f32.mrf.mxu0 }
 0x31a   : > { %1798 = vrot.lane.b32.xlu1 %v1284_v4, %s3898_s25  ;;  %v1276_v8 = vadd.f32 %v2862_v0, %v1275_v5  ;;  %v1292_v17 = vmax.f32 %v1284_v4, 0.0  ;;  %v3495_v4 = vld [vmem:[#allocation10 + $0x18] sm:$0xff]  }
 0x31b   : > { %v3117_v7 = vpop.f32.mrf.mxu0 }
 0x31c   : > { %v1287_v9 = vadd.f32 %v3117_v7, %v2862_v0  ;;  %v1290_v14 = vmax.f32 %v1276_v8, 0.0  ;;  %v3496_v7 = vld [vmem:[#allocation10 + $0x10] sm:$0xff]  }
 0x31d   : > { %v1278_v10 = vpop.f32.mrf.mxu0 }
 0x31e   : > { %v1279_v12 = vadd.f32 %v2862_v0, %v1278_v10  ;;  %1800 = vrot.lane.b32.xlu0 %v1287_v9, %s3898_s25  ;;  %1794 = vrot.lane.b32.xlu1 %v1276_v8, %s3898_s25  ;;  %v1293_v13 = vmax.f32 %v1287_v9, 0.0  ;;  %v3497_v8 = vld [vmem:[#allocation10 + $0x8] sm:$0xff]   ;;  %v3498_v9 = vld [vmem:[#allocation10] sm:$0xff]  }
 0x31f   : > { %v2889_v10 = vld [vmem:[%s4464_s18] ss:$0 sm:$0xff] }
 0x320   : > { %v1291_v15 = vmax.f32 %v1279_v12, 0.0  ;;  %v1295_v20 = vpack.c.bf16 %v1293_v13, %v1292_v17 }
 0x322   : > { %1796 = vrot.lane.b32.xlu0 %v1279_v12, %s3898_s25  ;;  %v1294_v19 = vpack.c.bf16 %v1291_v15, %v1290_v14  ;;  %s3904_s25 = smov [#allocation19]  }
 0x324   : > { %3134 = vmatprep.mubr.bf16.mxu1 %v1294_v19  ;;  %v3500_v19 = vld [vmem:[#allocation11 + $0x30] sm:$0xff]  }
 0x325   : > { %3135 = vmatmul.mubr.bf16.vlgmr.msra.gmra.mxu1 %v1295_v20 }
 0x326   : > { %3159 = vmatpush3.bf16.msra.mxu1 %v3483_v25  ;;  %v3502_v25 = vld [vmem:[#allocation11 + $0x20] sm:$0xff]  }
 0x327   : > { %3160 = vmatprep.subr.bf16.mxu1 %v3484_v26 }
 0x32a   : > { %3161 = vmatpush3.bf16.msra.mxu1 %v3484_v26  ;;  %v3503_v26 = vld [vmem:[#allocation11 + $0x18] sm:$0xff]  }
 0x32b   : > { %3162 = vmatprep.subr.bf16.mxu1 %v3485_v30 }
 0x32e   : > { %3163 = vmatpush3.bf16.msra.mxu1 %v3485_v30  ;;  %v3507_v30 = vld [vmem:[#allocation13 + $0x38] sm:$0xff]  }
 0x32f   : > { %3164 = vmatprep.subr.bf16.mxu1 %v3486_v35 }
 0x332   : > { %3165 = vmatpush3.bf16.msra.mxu1 %v3486_v35  ;;  %v3509_v35 = vld [vmem:[#allocation13 + $0x28] sm:$0xff]  }
 0x333   : > { %3166 = vmatprep.subr.bf16.mxu1 %v3487_v41 }
 0x336   : > { %3167 = vmatpush3.bf16.msra.mxu1 %v3487_v41  ;;  %v3510_v41 = vld [vmem:[#allocation13 + $0x20] sm:$0xff]  }
 0x337   : > { %3168 = vmatprep.subr.bf16.mxu1 %v3488_v44 }
 0x33a   : > { %3169 = vmatpush3.bf16.msra.mxu1 %v3488_v44 }
 0x33b   : > { %3170 = vmatprep.subr.bf16.mxu1 %v3489_v45 }
 0x33e   : > { %3171 = vmatpush3.bf16.msra.mxu1 %v3489_v45 }
 0x33f   : > { %3172 = vmatprep.subr.bf16.mxu1 %v3490_v46 }
 0x342   : > { %3173 = vmatpush3.bf16.msra.mxu1 %v3490_v46 }
 0x343   : > { %3198 = vmatprep.subr.bf16.mxu1 %v3499_v18 }
 0x3e5   : > { %v3136_v27 = vpop.f32.mrf.mxu1 }
 0x3e6   : > { %v1410_v28 = vadd.f32 %v3136_v27, %v2871_v24  ;;  %v3504_v27 = vld [vmem:[#allocation11 + $0x10] sm:$0xff]  }
 0x3e7   : > { %v1401_v29 = vpop.f32.mrf.mxu1 }
 0x3e8   : > { %1814 = vrot.lane.b32.xlu0 %v1410_v28, %s3899_s24  ;;  %v1402_v32 = vadd.f32 %v2871_v24, %v1401_v29  ;;  %v1418_v40 = vmax.f32 %v1410_v28, 0.0  ;;  %v3505_v28 = vld [vmem:[#allocation11 + $0x8] sm:$0xff]   ;;  %v3506_v29 = vld [vmem:[#allocation11] sm:$0xff]  }
 0x3e9   : > { %v3137_v31 = vpop.f32.mrf.mxu1 }
 0x3ea   : > { %v1413_v33 = vadd.f32 %v3137_v31, %v2871_v24  ;;  %v1416_v38 = vmax.f32 %v1402_v32, 0.0  ;;  %v3508_v31 = vld [vmem:[#allocation13 + $0x30] sm:$0xff]  }
 0x3eb   : > { %v1404_v34 = vpop.f32.mrf.mxu1 }
 0x3ec   : > { %v1405_v36 = vadd.f32 %v2871_v24, %v1404_v34  ;;  %1816 = vrot.lane.b32.xlu1 %v1413_v33, %s3899_s24  ;;  %1810 = vrot.lane.b32.xlu0 %v1402_v32, %s3899_s24  ;;  %v1419_v37 = vmax.f32 %v1413_v33, 0.0  ;;  %v2898_v33 = vld [vmem:[%s4465_s19] ss:$0 sm:$0xff] }
 0x3ee   : > { %v1417_v39 = vmax.f32 %v1405_v36, 0.0  ;;  %v1421_v43 = vpack.c.bf16 %v1419_v37, %v1418_v40 }
 0x3f0   : > { %1812 = vrot.lane.b32.xlu1 %v1405_v36, %s3899_s24  ;;  %v1420_v42 = vpack.c.bf16 %v1417_v39, %v1416_v38  ;;  %s2639_s24 = sshll.u32 %s4279_s26, 4  ;;  %s2640_s24 = int_to_ptr.vmem [resolvable:$true] %s2639_s24 }
 0x3f2   : > { %3154 = vmatprep.mubr.bf16.mxu0 %v1420_v42 }
 0x3f3   : > { %3155 = vmatmul.mubr.bf16.vlgmr.msra.gmra.mxu0 %v1421_v43 }
 0x3f4   : > { %3179 = vmatpush3.bf16.msra.mxu0 %v3491_v48 }
 0x3f5   : > { %3180 = vmatprep.subr.bf16.mxu0 %v3492_v49 }
 0x3f8   : > { %3181 = vmatpush3.bf16.msra.mxu0 %v3492_v49 }
 0x3f9   : > { %3182 = vmatprep.subr.bf16.mxu0 %v3493_v57 }
 0x3fc   : > { %3183 = vmatpush3.bf16.msra.mxu0 %v3493_v57  ;;  %v3515_v57 = vld [vmem:[#allocation14 + $0x38] sm:$0xff]  }
 0x3fd   : > { %3184 = vmatprep.subr.bf16.mxu0 %v3494_v62 }
 0x400   : > { %3185 = vmatpush3.bf16.msra.mxu0 %v3494_v62 }
 0x401   : > { %3186 = vmatprep.subr.bf16.mxu0 %v3495_v4 }
 0x404   : > { %3187 = vmatpush3.bf16.msra.mxu0 %v3495_v4 }
 0x405   : > { %3188 = vmatprep.subr.bf16.mxu0 %v3496_v7 }
 0x408   : > { %3189 = vmatpush3.bf16.msra.mxu0 %v3496_v7 }
 0x409   : > { %3190 = vmatprep.subr.bf16.mxu0 %v3497_v8 }
 0x40c   : > { %3191 = vmatpush3.bf16.msra.mxu0 %v3497_v8 }
 0x40d   : > { %3192 = vmatprep.subr.bf16.mxu0 %v3498_v9 }
 0x410   : > { %3193 = vmatpush3.bf16.msra.mxu0 %v3498_v9 }
 0x411   : > { %3218 = vmatprep.subr.bf16.mxu0 %v3507_v30 }
 0x4b3   : > { %v3156_v53 = vpop.f32.mrf.mxu0 }
 0x4b4   : > { %v1536_v55 = vadd.f32 %v3156_v53, %v2880_v47  ;;  %v3512_v53 = vld [vmem:[#allocation13 + $0x10] sm:$0xff]  }
 0x4b5   : > { %v1527_v56 = vpop.f32.mrf.mxu0 }
 0x4b6   : > { %1830 = vrot.lane.b32.xlu0 %v1536_v55, %s3900_s9  ;;  %v1528_v59 = vadd.f32 %v2880_v47, %v1527_v56  ;;  %v1544_v3 = vmax.f32 %v1536_v55, 0.0  ;;  %v3513_v55 = vld [vmem:[#allocation13 + $0x8] sm:$0xff]   ;;  %v3514_v56 = vld [vmem:[#allocation13] sm:$0xff]  }
 0x4b7   : > { %v3157_v58 = vpop.f32.mrf.mxu0 }
 0x4b8   : > { %v1539_v60 = vadd.f32 %v3157_v58, %v2880_v47  ;;  %v1542_v1 = vmax.f32 %v1528_v59, 0.0  ;;  %v3516_v58 = vld [vmem:[#allocation14 + $0x30] sm:$0xff]  }
 0x4b9   : > { %v1530_v61 = vpop.f32.mrf.mxu0 }
 0x4ba   : > { %v1531_v63 = vadd.f32 %v2880_v47, %v1530_v61  ;;  %1832 = vrot.lane.b32.xlu1 %v1539_v60, %s3900_s9  ;;  %1826 = vrot.lane.b32.xlu0 %v1528_v59, %s3900_s9  ;;  %v1545_v0 = vmax.f32 %v1539_v60, 0.0  ;;  %v3511_v47 = vld [vmem:[#allocation13 + $0x18] sm:$0xff]   ;;  %v3517_v59 = vld [vmem:[#allocation14 + $0x28] sm:$0xff]   ;;  %v3518_v60 = vld [vmem:[#allocation14 + $0x20] sm:$0xff]  }
 0x4bb   : > { %v3519_v61 = vld [vmem:[#allocation14 + $0x18] sm:$0xff]  }
 0x4bc   : > { %v1543_v2 = vmax.f32 %v1531_v63, 0.0  ;;  %v1547_v6 = vpack.c.bf16 %v1545_v0, %v1544_v3  ;;  %v2907_v0 = vld [vmem:[%s4466_s20] ss:$0 sm:$0xff] }
 0x4be   : > { %1828 = vrot.lane.b32.xlu1 %v1531_v63, %s3900_s9  ;;  %v1546_v5 = vpack.c.bf16 %v1543_v2, %v1542_v1  ;;  %s3902_s9 = smov 16  }
 0x4c0   : > { %3174 = vmatprep.mubr.bf16.mxu1 %v1546_v5 }
 0x4c1   : > { %3175 = vmatmul.mubr.bf16.vlgmr.msra.gmra.mxu1 %v1547_v6 }
 0x4c2   : > { %3199 = vmatpush3.bf16.msra.mxu1 %v3499_v18  ;;  %v3523_v18 = vld [vmem:[#allocation16 + $0x38] sm:$0xff]  }
 0x4c3   : > { %3200 = vmatprep.subr.bf16.mxu1 %v3500_v19 }
 0x4c6   : > { %3201 = vmatpush3.bf16.msra.mxu1 %v3500_v19  ;;  %v3524_v19 = vld [vmem:[#allocation16 + $0x30] sm:$0xff]  }
 0x4c7   : > { %3202 = vmatprep.subr.bf16.mxu1 %v3501_v23 }
 0x4ca   : > { %3203 = vmatpush3.bf16.msra.mxu1 %v3501_v23  ;;  %v3525_v23 = vld [vmem:[#allocation16 + $0x28] sm:$0xff]  }
 0x4cb   : > { %3204 = vmatprep.subr.bf16.mxu1 %v3502_v25 }
 0x4ce   : > { %3205 = vmatpush3.bf16.msra.mxu1 %v3502_v25 }
 0x4cf   : > { %3206 = vmatprep.subr.bf16.mxu1 %v3503_v26 }
 0x4d2   : > { %3207 = vmatpush3.bf16.msra.mxu1 %v3503_v26 }
 0x4d3   : > { %3208 = vmatprep.subr.bf16.mxu1 %v3504_v27 }
 0x4d6   : > { %3209 = vmatpush3.bf16.msra.mxu1 %v3504_v27 }
 0x4d7   : > { %3210 = vmatprep.subr.bf16.mxu1 %v3505_v28 }
 0x4da   : > { %3211 = vmatpush3.bf16.msra.mxu1 %v3505_v28  ;;  %v3526_v28 = vld [vmem:[#allocation16 + $0x20] sm:$0xff]  }
 0x4db   : > { %3212 = vmatprep.subr.bf16.mxu1 %v3506_v29 }
 0x4de   : > { %3213 = vmatpush3.bf16.msra.mxu1 %v3506_v29 }
 0x4df   : > { %3238 = vmatprep.subr.bf16.mxu1 %v3515_v57 }
 0x581   : > { %v3176_v11 = vpop.f32.mrf.mxu1 }
 0x582   : > { %v1662_v12 = vadd.f32 %v3176_v11, %v2889_v10 }
 0x583   : > { %v1653_v13 = vpop.f32.mrf.mxu1 }
 0x584   : > { %v1654_v14 = vadd.f32 %v2889_v10, %v1653_v13  ;;  %2594 = vperm.xlu1 %3449, %v1662_v12   ;;  %v3520_v13 = vld [vmem:[#allocation14 + $0x10] sm:$0xff]  }
 0x585   : > { %v3177_v15 = vpop.f32.mrf.mxu1 }
 0x586   : > { %v1665_v17 = vadd.f32 %v3177_v15, %v2889_v10  ;;  %2584 = vperm.xlu0 %3450, %v1654_v14   ;;  %v3522_v15 = vld [vmem:[#allocation14] sm:$0xff]  }
 0x587   : > { %v1656_v20 = vpop.f32.mrf.mxu1 }
 0x588   : > { %v1657_v21 = vadd.f32 %v2889_v10, %v1656_v20  ;;  %2599 = vperm.xlu1 %3449, %v1665_v17   ;;  %v1669_v24 = vpack.c.bf16 %v1665_v17, %v1662_v12  ;;  %v2916_v17 = vld [vmem:[%s4467_s21] ss:$0 sm:$0xff] }
 0x58a   : > { %v1668_v22 = vpack.c.bf16 %v1657_v21, %v1654_v14  ;;  %2589 = vperm.xlu0 %3450, %v1657_v21   ;;  %v3521_v14 = vld [vmem:[#allocation14 + $0x8] sm:$0xff]  }
 0x58c   : > { %3194 = vmatprep.mubr.bf16.mxu0 %v1668_v22 }
 0x58d   : > { %3195 = vmatmul.mubr.bf16.vlgmr.msra.gmra.mxu0 %v1669_v24 }
 0x58e   : > { %3219 = vmatpush3.bf16.msra.mxu0 %v3507_v30 }
 0x58f   : > { %3220 = vmatprep.subr.bf16.mxu0 %v3508_v31 }
 0x592   : > { %3221 = vmatpush3.bf16.msra.mxu0 %v3508_v31 }
 0x593   : > { %3222 = vmatprep.subr.bf16.mxu0 %v3509_v35 }
 0x596   : > { %3223 = vmatpush3.bf16.msra.mxu0 %v3509_v35 }
 0x597   : > { %3224 = vmatprep.subr.bf16.mxu0 %v3510_v41 }
 0x59a   : > { %3225 = vmatpush3.bf16.msra.mxu0 %v3510_v41  ;;  %v3530_v41 = vld [vmem:[#allocation16] sm:$0xff]  }
 0x59b   : > { %3226 = vmatprep.subr.bf16.mxu0 %v3511_v47 }
 0x59e   : > { %3227 = vmatpush3.bf16.msra.mxu0 %v3511_v47 }
 0x59f   : > { %3228 = vmatprep.subr.bf16.mxu0 %v3512_v53 }
 0x5a2   : > { %3229 = vmatpush3.bf16.msra.mxu0 %v3512_v53 }
 0x5a3   : > { %3230 = vmatprep.subr.bf16.mxu0 %v3513_v55 }
 0x5a6   : > { %3231 = vmatpush3.bf16.msra.mxu0 %v3513_v55  ;;  %v3531_v55 = vld [vmem:[#allocation17 + $0x38] sm:$0xff]  }
 0x5a7   : > { %3232 = vmatprep.subr.bf16.mxu0 %v3514_v56 }
 0x5aa   : > { %3233 = vmatpush3.bf16.msra.mxu0 %v3514_v56 }
 0x5ab   : > { %3258 = vmatprep.subr.bf16.mxu0 %v3523_v18 }
 0x64d   : > { %v3196_v32 = vpop.f32.mrf.mxu0 }
 0x64e   : > { %v4315_v39 = vadd.f32 %v3196_v32, %v2898_v33 }
 0x64f   : > { %v1775_v34 = vpop.f32.mrf.mxu0 }
 0x650   : > { %v1776_v36 = vadd.f32 %v2898_v33, %v1775_v34  ;;  %v1885_v46 = vmax.f32 %v4315_v39, 0.0  ;;  %v3527_v34 = vld [vmem:[#allocation16 + $0x18] sm:$0xff]  }
 0x651   : > { %v3197_v37 = vpop.f32.mrf.mxu0 }
 0x652   : > { %v4312_v38 = vadd.f32 %v3197_v37, %v2898_v33  ;;  %1842 = vrot.lane.b32.xlu0 %v1776_v36, %s3901_s28  ;;  %v1883_v44 = vmax.f32 %v1776_v36, 0.0  ;;  %v3528_v37 = vld [vmem:[#allocation16 + $0x10] sm:$0xff]  }
 0x653   : > { %v1778_v40 = vpop.f32.mrf.mxu0 }
 0x654   : > { %v1779_v42 = vadd.f32 %v2898_v33, %v1778_v40  ;;  %v1886_v43 = vmax.f32 %v4312_v38, 0.0  ;;  %v3529_v40 = vld [vmem:[#allocation16 + $0x8] sm:$0xff]  }
 0x656   : > { %v1884_v45 = vmax.f32 %v1779_v42, 0.0  ;;  %1844 = vrot.lane.b32.xlu1 %v1779_v42, %s3901_s28  ;;  %v1888_v49 = vpack.c.bf16 %v1886_v43, %v1885_v46  ;;  %v2925_v42 = vld [vmem:[%s4468_s22] ss:$0 sm:$0xff] }
 0x658   : > { %v1887_v48 = vpack.c.bf16 %v1884_v45, %v1883_v44 }
 0x65a   : > { %3214 = vmatprep.mubr.bf16.mxu1 %v1887_v48 }
 0x65b   : > { %3215 = vmatmul.mubr.bf16.vlgmr.msra.gmra.mxu1 %v1888_v49 }
 0x65c   : > { %3239 = vmatpush3.bf16.msra.mxu1 %v3515_v57  ;;  %v3532_v57 = vld [vmem:[#allocation17 + $0x30] sm:$0xff]  }
 0x65d   : > { %3240 = vmatprep.subr.bf16.mxu1 %v3516_v58 }
 0x660   : > { %3241 = vmatpush3.bf16.msra.mxu1 %v3516_v58 }
 0x661   : > { %3242 = vmatprep.subr.bf16.mxu1 %v3517_v59 }
 0x664   : > { %3243 = vmatpush3.bf16.msra.mxu1 %v3517_v59 }
 0x665   : > { %3244 = vmatprep.subr.bf16.mxu1 %v3518_v60 }
 0x668   : > { %3245 = vmatpush3.bf16.msra.mxu1 %v3518_v60 }
 0x669   : > { %3246 = vmatprep.subr.bf16.mxu1 %v3519_v61 }
 0x66c   : > { %3247 = vmatpush3.bf16.msra.mxu1 %v3519_v61 }
 0x66d   : > { %3248 = vmatprep.subr.bf16.mxu1 %v3520_v13 }
 0x670   : > { %3249 = vmatpush3.bf16.msra.mxu1 %v3520_v13  ;;  %v3537_v13 = vld [vmem:[#allocation17 + $0x8] sm:$0xff]  }
 0x671   : > { %3250 = vmatprep.subr.bf16.mxu1 %v3521_v14 }
 0x674   : > { %3251 = vmatpush3.bf16.msra.mxu1 %v3521_v14 }
 0x675   : > { %3252 = vmatprep.subr.bf16.mxu1 %v3522_v15 }
 0x678   : > { %3253 = vmatpush3.bf16.msra.mxu1 %v3522_v15  ;;  %v3538_v15 = vld [vmem:[#allocation17] sm:$0xff]  }
 0x679   : > { %3278 = vmatprep.subr.bf16.mxu1 %v3531_v55 }
 0x71b   : > { %v3216_v62 = vpop.f32.mrf.mxu1 }
 0x71c   : > { %v4327_v4 = vadd.f32 %v3216_v62, %v2907_v0  ;;  %v3533_v62 = vld [vmem:[#allocation17 + $0x28] sm:$0xff]  }
 0x71d   : > { %v1994_v63 = vpop.f32.mrf.mxu1 }
 0x71e   : > { %v4323_v2 = vadd.f32 %v2907_v0, %v1994_v63  ;;  %v2011_v10 = vmax.f32 %v4327_v4, 0.0 }
 0x71f   : > { %v3217_v1 = vpop.f32.mrf.mxu1 }
 0x720   : > { %v4325_v3 = vadd.f32 %v3217_v1, %v2907_v0  ;;  %v2009_v8 = vmax.f32 %v4323_v2, 0.0  ;;  %v3535_v1 = vld [vmem:[#allocation17 + $0x18] sm:$0xff]  }
 0x721   : > { %v1997_v5 = vpop.f32.mrf.mxu1 }
 0x722   : > { %v4329_v6 = vadd.f32 %v2907_v0, %v1997_v5  ;;  %v2012_v7 = vmax.f32 %v4325_v3, 0.0  ;;  %v3534_v0 = vld [vmem:[#allocation17 + $0x20] sm:$0xff]   ;;  %v1801_v5 = vpop.permute.xlu0 %1800 }
 0x724   : > { %v2010_v9 = vmax.f32 %v4329_v6, 0.0  ;;  %v2014_v12 = vpack.c.bf16 %v2012_v7, %v2011_v10 }
 0x726   : > { %v2013_v11 = vpack.c.bf16 %v2010_v9, %v2009_v8  ;;  %v1797_v7 = vpop.permute.xlu0 %1796 }
 0x728   : > { %3234 = vmatprep.mubr.bf16.mxu0 %v2013_v11  ;;  %v3536_v11 = vld [vmem:[#allocation17 + $0x10] sm:$0xff]  }
 0x729   : > { %3235 = vmatmul.mubr.bf16.vlgmr.msra.gmra.mxu0 %v2014_v12 }
 0x72a   : > { %3259 = vmatpush3.bf16.msra.mxu0 %v3523_v18  ;;  %v1815_v9 = vpop.permute.xlu0 %1814 }
 0x72b   : > { %3260 = vmatprep.subr.bf16.mxu0 %v3524_v19 }
 0x72e   : > { %3261 = vmatpush3.bf16.msra.mxu0 %v3524_v19  ;;  %v1811_v12 = vpop.permute.xlu0 %1810 }
 0x72f   : > { %3262 = vmatprep.subr.bf16.mxu0 %v3525_v23 }
 0x732   : > { %3263 = vmatpush3.bf16.msra.mxu0 %v3525_v23  ;;  %v1831_v14 = vpop.permute.xlu0 %1830 }
 0x733   : > { %3264 = vmatprep.subr.bf16.mxu0 %v3526_v28 }
 0x736   : > { %3265 = vmatpush3.bf16.msra.mxu0 %v3526_v28  ;;  %v1827_v18 = vpop.permute.xlu0 %1826 }
 0x737   : > { %3266 = vmatprep.subr.bf16.mxu0 %v3527_v34 }
 0x73a   : > { %3267 = vmatpush3.bf16.msra.mxu0 %v3527_v34 }
 0x73b   : > { %3268 = vmatprep.subr.bf16.mxu0 %v3528_v37 }
 0x73e   : > { %3269 = vmatpush3.bf16.msra.mxu0 %v3528_v37 }
 0x73f   : > { %3270 = vmatprep.subr.bf16.mxu0 %v3529_v40 }
 0x742   : > { %3271 = vmatpush3.bf16.msra.mxu0 %v3529_v40  ;;  %v1856_v40 = vsel %vm1854_vm10, %v4291_v54, %v1797_v7 }
 0x743   : > { %3272 = vmatprep.subr.bf16.mxu0 %v3530_v41 }
 0x746   : > { %3273 = vmatpush3.bf16.msra.mxu0 %v3530_v41 }
 0x7e9   : > { %v3236_v20 = vpop.f32.mrf.mxu0 }
 0x7ea   : > { %v2129_v21 = vadd.f32 %v3236_v20, %v2916_v17  ;;  %v4345_v20 = vpop.permute.xlu0 %2584 }
 0x7eb   : > { %v2120_v22 = vpop.f32.mrf.mxu0 }
 0x7ec   : > { %2269 = vrot.lane.b32.xlu0 %v2129_v21, %s3902_s9  ;;  %v2121_v25 = vadd.f32 %v2916_v17, %v2120_v22  ;;  %v2137_v33 = vmax.f32 %v2129_v21, 0.0 }
 0x7ed   : > { %v3237_v24 = vpop.f32.mrf.mxu0 }
 0x7ee   : > { %v2132_v26 = vadd.f32 %v3237_v24, %v2916_v17  ;;  %v2135_v31 = vmax.f32 %v2121_v25, 0.0  ;;  %v4349_v22 = vpop.permute.xlu0 %2589 }
 0x7ef   : > { %v2123_v27 = vpop.f32.mrf.mxu0 }
 0x7f0   : > { %v2124_v29 = vadd.f32 %v2916_v17, %v2123_v27  ;;  %2271 = vrot.lane.b32.xlu1 %v2132_v26, %s3902_s9  ;;  %2265 = vrot.lane.b32.xlu0 %v2121_v25, %s3902_s9  ;;  %v2138_v30 = vmax.f32 %v2132_v26, 0.0 }
 0x7f2   : > { %v2136_v32 = vmax.f32 %v2124_v29, 0.0  ;;  %v2140_v36 = vpack.c.bf16 %v2138_v30, %v2137_v33  ;;  %v1843_v24 = vpop.permute.xlu0 %1842 }
 0x7f4   : > { %2267 = vrot.lane.b32.xlu1 %v2124_v29, %s3902_s9  ;;  %v2139_v35 = vpack.c.bf16 %v2136_v32, %v2135_v31  ;;  %s4531_s9 = sld [smem:[#allocation46_spill]] }
 0x7f6   : > { %3254 = vmatprep.mubr.bf16.mxu1 %v2139_v35 }
 0x7f7   : > { %3255 = vmatmul.mubr.bf16.vlgmr.msra.gmra.mxu1 %v2140_v36 }
 0x7f8   : > { %3279 = vmatpush3.bf16.msra.mxu1 %v3531_v55 }
 0x7f9   : > { %3280 = vmatprep.subr.bf16.mxu1 %v3532_v57 }
 0x7fa   : > { %s2637_s1 = scalar_lea.hbm %s4531_s9, %s2958_s27 }
 0x7fc   : > { %3281 = vmatpush3.bf16.msra.mxu1 %v3532_v57 }
 0x7fd   : > { %3282 = vmatprep.subr.bf16.mxu1 %v3533_v62 }
 0x800   : > { %3283 = vmatpush3.bf16.msra.mxu1 %v3533_v62 }
 0x801   : > { %3284 = vmatprep.subr.bf16.mxu1 %v3534_v0 }
 0x804   : > { %3285 = vmatpush3.bf16.msra.mxu1 %v3534_v0 }
 0x805   : > { %3286 = vmatprep.subr.bf16.mxu1 %v3535_v1 }
 0x808   : > { %3287 = vmatpush3.bf16.msra.mxu1 %v3535_v1  ;;  %v2934_v1 = vld [vmem:[%s4469_s23] ss:$0 sm:$0xff] }
 0x809   : > { %3288 = vmatprep.subr.bf16.mxu1 %v3536_v11 }
 0x80c   : > { %3289 = vmatpush3.bf16.msra.mxu1 %v3536_v11 }
 0x80d   : > { %3290 = vmatprep.subr.bf16.mxu1 %v3537_v13 }
 0x810   : > { %3291 = vmatpush3.bf16.msra.mxu1 %v3537_v13 }
 0x811   : > { %3292 = vmatprep.subr.bf16.mxu1 %v3538_v15 }
 0x814   : > { %3293 = vmatpush3.bf16.msra.mxu1 %v3538_v15 }
 0x85e   : > { %v2270_v26 = vpop.permute.xlu0 %2269 }
 0x85f   : > { %v2296_v31 = vsel %vm2293_vm9, %v4327_v4, %v2270_v26  ;;  %v1858_v4 = vsel %vm1854_vm10, %v4287_v51, %v1801_v5 }
 0x862   : > { %v2266_v28 = vpop.permute.xlu0 %2265 }
 0x863   : > { %v2294_v34 = vsel %vm2293_vm9, %v4323_v2, %v2266_v28 }
 0x8b7   : > { %v3256_v43 = vpop.f32.mrf.mxu1 }
 0x8b8   : > { %v2255_v44 = vadd.f32 %v3256_v43, %v2925_v42 }
 0x8b9   : > { %v2246_v45 = vpop.f32.mrf.mxu1 }
 0x8ba   : > { %2285 = vrot.lane.b32.xlu0 %v2255_v44, %s3903_s5  ;;  %v2247_v47 = vadd.f32 %v2925_v42, %v2246_v45  ;;  %v2318_v60 = vmax.f32 %v2255_v44, 0.0 }
 0x8bb   : > { %v3257_v46 = vpop.f32.mrf.mxu1 }
 0x8bc   : > { %v2258_v48 = vadd.f32 %v3257_v46, %v2925_v42  ;;  %v2316_v58 = vmax.f32 %v2247_v47, 0.0 }
 0x8bd   : > { %v2249_v49 = vpop.f32.mrf.mxu1 }
 0x8be   : > { %v2250_v53 = vadd.f32 %v2925_v42, %v2249_v49  ;;  %2287 = vrot.lane.b32.xlu1 %v2258_v48, %s3903_s5  ;;  %2281 = vrot.lane.b32.xlu0 %v2247_v47, %s3903_s5  ;;  %v2319_v56 = vmax.f32 %v2258_v48, 0.0 }
 0x8c0   : > { %v2317_v59 = vmax.f32 %v2250_v53, 0.0  ;;  %v2321_v63 = vpack.c.bf16 %v2319_v56, %v2318_v60 }
 0x8c2   : > { %2283 = vrot.lane.b32.xlu1 %v2250_v53, %s3903_s5  ;;  %1846 = vrot.lane.b32.xlu0 %v4315_v39, %s3901_s28  ;;  %v2320_v61 = vpack.c.bf16 %v2317_v59, %v2316_v58  ;;  %v1799_v39 = vpop.permute.xlu1 %1798  ;;  %s3799_s5 = scalar_lea.vmem %s2640_s24, 512 }
 0x8c3   : > { %v1857_v32 = vsel %vm1854_vm10, %v4289_v52, %v1799_v39  ;;  %p3800_p7 = scmp.ne.s32.totalorder %s2640_s24, %s3799_s5 }
 0x8c4   : > { %3274 = vmatprep.mubr.bf16.mxu0 %v2320_v61  ;;  %v1862_v48 = vsel %vm1859_vm12, %v1857_v32, %v1815_v9 }
 0x8c5   : > { %3275 = vmatmul.mubr.bf16.vlgmr.msra.gmra.mxu0 %v2321_v63  ;;  %v1867_v56 = vsel %vm1864_vm13, %v1862_v48, %v1831_v14  ;;  %p3801_p0 = pnand %p3800_p7, %p4079_p5 }
 0x8c6   : > { %1848 = vrot.lane.b32.xlu1 %v4312_v38, %s3901_s28  ;;  %v1795_v8 = vpop.permute.xlu1 %1794  ;;  %s3803_s28 = sshll.u32 %s3904_s25, 4  ;;  %s3804_s28 = int_to_ptr.vmem [resolvable:$false] %s3803_s28 }
 0x8c7   : > { %v1855_v52 = vsel %vm1854_vm10, %v4285_v50, %v1795_v8  ;;  %p3802_p3 = pneg %p3801_p0  ;;  %s3805_s10 = scalar_lea.vmem %s3804_s28, 1024 }
 0x8c8   : > { %v1860_v2 = vsel %vm1859_vm12, %v1855_v52, %v1811_v12  ;;  %p3806_p2 = scmp.lt.s32.totalorder %s2640_s24, %s3804_s28  ;;  %p3807_p12 = scmp.lt.s32.totalorder %s3805_s10, %s3799_s5 }
 0x8c9   : > { %v1865_v53 = vsel %vm1864_vm13, %v1860_v2, %v1827_v18 }
 0x8ca   : > { %v1817_v10 = vpop.permute.xlu1 %1816  ;;  %v1870_v57 = vsel %vm1869_vm14, %v1865_v53, %v1843_v24  ;;  %p3808_p10 = por %p3807_p12, %p3806_p2 }
 0x8cb   : > { %v1863_v49 = vsel %vm1859_vm12, %v1858_v4, %v1817_v10  ;;  %vm1874_vm6 = vcmp.ge.f32.partialorder %v1870_v57, 0.0 }
 0x8cc   : > { %p3809_p1 = pnand %p3808_p10, %p3802_p3 }
 0x8ce   : > { %v1813_v38 = vpop.permute.xlu1 %1812 }
 0x8d2   : > { %v1833_v17 = vpop.permute.xlu1 %1832 }
 0x8d3   : > { %v1868_v59 = vsel %vm1864_vm13, %v1863_v49, %v1833_v17 }
 0x8d6   : > { %v1829_v19 = vpop.permute.xlu1 %1828 }
 0x8da   : > { %v4347_v21 = vpop.permute.xlu1 %2594 }
 0x8de   : > { %v4351_v23 = vpop.permute.xlu1 %2599 }
 0x8e2   : > { %v1845_v25 = vpop.permute.xlu1 %1844 }
 0x8e6   : > { %v2272_v27 = vpop.permute.xlu1 %2271 }
 0x8e7   : > { %v2297_v33 = vsel %vm2293_vm9, %v4325_v3, %v2272_v27  ;;  %v1861_v3 = vsel %vm1859_vm12, %v1856_v40, %v1813_v38 }
 0x8e8   : > { %v1866_v44 = vsel %vm1864_vm13, %v1861_v3, %v1829_v19 }
 0x8e9   : > { %v1871_v45 = vsel %vm1869_vm14, %v1866_v44, %v1845_v25 }
 0x8ea   : > { %v2268_v29 = vpop.permute.xlu1 %2267  ;;  %vm1875_vm1 = vcmp.ge.f32.partialorder %v1871_v45, 0.0 }
 0x8eb   : > { %v2295_v46 = vsel %vm2293_vm9, %v4329_v6, %v2268_v29  ;;  %vm1878_vm8 = vmpackc.low %vm1875_vm1, %vm1874_vm6 }
 0x92c   : > { %v2286_v30 = vpop.permute.xlu0 %2285 }
 0x92d   : > { %v2301_v35 = vsel %vm2298_vm11, %v2296_v31, %v2286_v30 }
 0x92e   : > { %v2305_v54 = vsel %vm1864_vm13, %v2301_v35, 0.0 }
 0x92f   : > { %vm2309_vm0 = vcmp.ge.f32.partialorder %v2305_v54, 0.0 }
 0x930   : > { %v2288_v36 = vpop.permute.xlu1 %2287  ;;  %v2282_v37 = vpop.permute.xlu0 %2281 }
 0x931   : > { %v2302_v41 = vsel %vm2298_vm11, %v2297_v33, %v2288_v36  ;;  %v2299_v42 = vsel %vm2298_vm11, %v2294_v34, %v2282_v37 }
 0x932   : > { %v2306_v43 = vsel %vm1864_vm13, %v2302_v41, 0.0  ;;  %v2303_v51 = vsel %vm1864_vm13, %v2299_v42, 0.0 }
 0x933   : > { %vm2310_vm15 = vcmp.ge.f32.partialorder %v2306_v43, 0.0  ;;  %vm2307_vm3 = vcmp.ge.f32.partialorder %v2303_v51, 0.0 }
 0x934   : > { %v2284_v50 = vpop.permute.xlu1 %2283  ;;  %v1847_v47 = vpop.permute.xlu0 %1846  ;;  %vm2312_vm2 = vmpackc.low %vm2310_vm15, %vm2309_vm0 }
 0x935   : > { %v2300_v55 = vsel %vm2298_vm11, %v2295_v46, %v2284_v50  ;;  %v1872_v58 = vsel %vm1869_vm14, %v1867_v56, %v1847_v47 }
 0x936   : > { %v2304_v6 = vsel %vm1864_vm13, %v2300_v55, 0.0  ;;  %vm1876_vm9 = vcmp.ge.f32.partialorder %v1872_v58, 0.0 }
 0x937   : > { %vm2308_vm4 = vcmp.ge.f32.partialorder %v2304_v6, 0.0 }
 0x938   : > { %vm2311_vm5 = vmpackc.low %vm2308_vm4, %vm2307_vm3  ;;  %v1849_v60 = vpop.permute.xlu1 %1848 }
 0x939   : > { %vm2313_vm7 = vmpackc.even %vm2312_vm2, %vm2311_vm5  ;;  %v1873_v61 = vsel %vm1869_vm14, %v1868_v59, %v1849_v60 }
 0x93a   : > { %v2314_v62 = vsel %vm2313_vm7, 16843009, %v3897_v16  ;;  %vm1877_vm10 = vcmp.ge.f32.partialorder %v1873_v61, 0.0 }
 0x93b   : > { %2315 = vst [vmem:[%s4279_s26 + $0x10] sm:$0xff] %v2314_v62  ;;  %vm1879_vm11 = vmpackc.low %vm1877_vm10, %vm1876_vm9 }
 0x93c   : > { %vm1880_vm12 = vmpackc.even %vm1879_vm11, %vm1878_vm8 }
 0x93d   : > { %v1881_v63 = vsel %vm1880_vm12, 16843009, %v3897_v16 }
 0x93e   : > { %1882 = vst [vmem:[%s4279_s26 + $0x8] sm:$0xff] %v1881_v63 }
 0x985   : > { %v3276_v0 = vpop.f32.mrf.mxu0 }
 0x986   : > { %v2436_v39 = vadd.f32 %v3276_v0, %v2934_v1 }
 0x987   : > { %v2427_v5 = vpop.f32.mrf.mxu0 }
 0x988   : > { %v2428_v8 = vadd.f32 %v2934_v1, %v2427_v5  ;;  %vm2444_vm14 = vcmp.ge.f32.partialorder %v2436_v39, 0.0  ;;  %v2453_v14 = vmax.f32 %v2436_v39, 0.0 }
 0x989   : > { %v3277_v7 = vpop.f32.mrf.mxu0 }
 0x98a   : > { %v2439_v9 = vadd.f32 %v3277_v7, %v2934_v1  ;;  %vm2442_vm15 = vcmp.ge.f32.partialorder %v2428_v8, 0.0  ;;  %v2451_v13 = vmax.f32 %v2428_v8, 0.0 }
 0x98b   : > { %v2430_v10 = vpop.f32.mrf.mxu0 }
 0x98c   : > { %vm2445_vm13 = vcmp.ge.f32.partialorder %v2439_v9, 0.0  ;;  %v2431_v11 = vadd.f32 %v2934_v1, %v2430_v10  ;;  %v2454_v12 = vmax.f32 %v2439_v9, 0.0 }
 0x98d   : > { %vm2447_vm0 = vmpackc.low %vm2445_vm13, %vm2444_vm14 }
 0x98e   : > { %vm2443_vm1 = vcmp.ge.f32.partialorder %v2431_v11, 0.0  ;;  %v2452_v38 = vmax.f32 %v2431_v11, 0.0  ;;  %v2456_v17 = vpack.c.bf16 %v2454_v12, %v2453_v14 }
 0x98f   : > { %vm2446_vm2 = vmpackc.low %vm2443_vm1, %vm2442_vm15 }
 0x990   : > { %vm2448_vm3 = vmpackc.even %vm2447_vm0, %vm2446_vm2  ;;  %v2455_v15 = vpack.c.bf16 %v2452_v38, %v2451_v13 }
 0x991   : > { %v2449_v18 = vsel %vm2448_vm3, 16843009, %v3897_v16 }
 0x992   : > { %2450 = vst [vmem:[%s4279_s26 + $0x18] sm:$0xff] %v2449_v18  ;;  %3294 = vmatprep.mubr.bf16.mxu1 %v2455_v15 }
 0x993   : > { %3295 = vmatmul.mubr.bf16.vlgmr.msra.gmra.mxu1 %v2456_v17 }
 0x994   : > { %3812 = shalt.err (!%p3809_p1)
}
 0x995   : > { %s3813_s8 = scalar_lea.hbm %s2637_s1, 512  ;;  %s3817_s27 = scalar_lea.hbm %s4531_s9, 1024 }
 0x996   : > { %p3814_p4 = scmp.ne.s32.totalorder %s2637_s1, %s3813_s8  ;;  %p3818_p11 = scmp.lt.s32.totalorder %s2637_s1, %s4531_s9 }
 0x997   : > { %p3819_p13 = scmp.lt.s32.totalorder %s3817_s27, %s3813_s8 }
 0x998   : > { %p3815_p9 = pnand %p3814_p4, %p4079_p5 }
 0x999   : > { %p3820_p7 = por %p3819_p13, %p3818_p11 }
 0x99a   : > { %p3816_p8 = pneg %p3815_p9 }
 0x99c   : > { %p3821_p0 = pnand %p3820_p7, %p3816_p8 }
 0x99e   : > { %3824 = shalt.err (!%p3821_p0)
}
 0x99f   : > { %3339 = dma.vmem_to_hbm [thread:$0]  (%p4079_p5), %s2640_s24, 512, %s2637_s1, %s2621_s7   ;;  %v2577_v16 = vlaneseq  ;;  %v3905_v25 = vmov 0.0   ;;  %vm2610_vm5 = vcmask 64512  }
 0x9a0   : > { %s4532_s25 = sld [smem:[#allocation44_spill]]  ;;  %s4533_s28 = sshll.u32 %s4544_s29, 3 }
 0x9a1   : > { %v2578_v19 = vand.u32 127, %v2577_v16  ;;  %s4534_s2 = sld [smem:[#allocation45_spill]] }
 0x9a3   : > { %vm2579_vm4 = vcmp.eq.s32.totalorder %v2578_v19, 2 }
 0x9a4   : > { %v2952_v26 = vsel %vm2579_vm4, 1.0, %v3905_v25 }
 0x9a5   : > { %v2602_v29 = vmul.f32 %v2952_v26, %v4345_v20  ;;  %v2603_v35 = vmul.f32 %v2952_v26, %v4349_v22  ;;  %v2604_v40 = vmul.f32 %v2952_v26, %v4347_v21  ;;  %v2605_v20 = vmul.f32 %v2952_v26, %v4351_v23 }
 0x9a6   : > { %v2943_v27 = vld [vmem:[%s4532_s25] ss:$0 sm:$0xff] }
 0x9a7   : > { %s950_s26 = scalar_lea.vmem %s4534_s2, %s4533_s28 }
 0xa53   : > { %v3296_v24 = vpop.f32.mrf.mxu1 }
 0xa54   : > { %v2571_v33 = vadd.f32 %v3296_v24, %v2943_v27 }
 0xa55   : > { %v2562_v28 = vpop.f32.mrf.mxu1 }
 0xa56   : > { %v2563_v30 = vadd.f32 %v2943_v27, %v2562_v28  ;;  %v2608_v42 = vadd.f32 %v2604_v40, %v2571_v33 }
 0xa57   : > { %v3297_v31 = vpop.f32.mrf.mxu1 }
 0xa58   : > { %v2606_v32 = vadd.f32 %v2602_v29, %v2563_v30  ;;  %v2574_v36 = vadd.f32 %v3297_v31, %v2943_v27  ;;  %2613 = vst.msk [vmem:[%s950_s26 + $0x10] sm:$0xff] %vm2610_vm5, %v2608_v42 }
 0xa59   : > { %v2565_v34 = vpop.f32.mrf.mxu1 }
 0xa5a   : > { %2611 = vst.msk [vmem:[%s950_s26] sm:$0xff] %vm2610_vm5, %v2606_v32  ;;  %v2566_v37 = vadd.f32 %v2943_v27, %v2565_v34  ;;  %v2609_v4 = vadd.f32 %v2605_v20, %v2574_v36 }
 0xa5c   : > { %v2607_v41 = vadd.f32 %v2603_v35, %v2566_v37  ;;  %2614 = vst.msk [vmem:[%s950_s26 + $0x18] sm:$0xff] %vm2610_vm5, %v2609_v4 }
 0xa5e   : > { %2612 = vst.msk [vmem:[%s950_s26 + $0x8] sm:$0xff] %vm2610_vm5, %v2607_v41 }
 0xa5f PF: > { %s4535_s29 = sld [smem:[#allocation29_spill]] }
 0xa60   : > { %s4536_s24 = sld [smem:[#allocation27_spill]] }
 0xa65   : > { %p3396_p5 = scmp.ge.s32.totalorder %s4535_s29, 2 }
 0xa66   : > { %s2659_s7 = sand.u32 1, %s4536_s24  }
 0xa67   : > { %p3373_p3 = pnand %p3396_p5, %p4083_p6  ;;  %s2660_s27 = scalar_lea.sflag [#allocation4], %s2659_s7 }
 0xa69   : > { %p3374_p2 = pneg %p3373_p3 }
 0xa6b   : > { %3866 = dma.done.wait (%p3374_p2), %s2660_s27, 512  }
 0xa6c   : > { %3868 = vsyncadd (%p3374_p2), %s2660_s27, 4294966784  ;;  %s4538_s28 = sld [smem:[#allocation30_spill]]  ;;  %s4541_s27 = smov %s3875_s3 }
 0xa6d   : > { %s4539_s4 = sld [smem:[#allocation28_spill]] }
 0xa6e   : > { %s4540_s7 = sld [smem:[#allocation31_spill]] }
 0xa72   : > { %p43_p12 = scmp.ge.s32.totalorder %s4538_s28, 4  }
 0xa73   : > { %s4542_s3 = smov %s4539_s4 }
 0xa74   :  { %45 = sbr.rel (!%p43_p12) target bundleno = 24 (0x18), region = 208 }
 0xa79   :  { %2665 = vsyncpa [#allocation3], 1 }
 0xa7a   :  { %2667 = vsyncpa [#allocation3 + $0x1], 1 }
 0xa7b   :  { %2668 = vsyncpa [#allocation6], 1 }
 0xa7c   :  { %2669 = vsyncpa [#allocation9], 1 }
 0xa7d   :  { %2670 = vsyncpa [#allocation12], 1 }
 0xa7e   :  { %2671 = vsyncpa [#allocation15], 1 }
 0xa7f   :  { %2672 = vsyncpa [#allocation18], 1 }
 0xa80   :  { %2673 = vsyncpa [#allocation4], 1 }
 0xa81   :  { %2675 = vsyncpa [#allocation4 + $0x1], 1 }

</bundles_post_ra>
